<compile_context>
chip_gen: v7x
topology: tpu7x:2x2x1
jax: 0.10.0
libtpu: 0.0.40
codegen_flags: <defaults>
</compile_context>

<pallas_src>
import functools

import jax
import jax.numpy as jnp
from jax.experimental import pallas as pl
from jax.experimental.pallas import tpu as pltpu

_VMEM_LIMIT = 32 * 1024 * 1024   # explicit scoped VMEM; safe on v5e/v6e/v7x


# ----------------------------------------------------------------------------
# tile-size helpers
# ----------------------------------------------------------------------------
def _round_up(x, m):
    return (x + m - 1) // m * m


def _pick_bn_block(bn, cap=256):
    """bn must already be padded to a multiple of 8.  Prefer >=2 tiles
    (v7x megacore) while keeping each tile as large as possible."""
    assert bn % 8 == 0
    cands = [t for t in range(8, min(bn, cap) + 1, 8) if bn % t == 0]
    best = cands[-1]
    two_tile = [t for t in cands if bn // t >= 2]
    if two_tile:
        best = two_tile[-1]
    return best


def _pick_lane_block(dim, cap=512):
    """Lane tile: multiple of 128 dividing `dim`, else the full dim."""
    if dim % 128 != 0:
        return dim           # TODO(synk): ragged vocab needs a masked tail tile
    best, t = 128, 256
    while t <= min(dim, cap):
        if dim % t == 0:
            best = t
        t += 128
    return best


def _pick_t_block(T, cap=8):
    """Largest divisor of T that is <= cap (bounds the unrolled inner loop)."""
    best = 1
    for t in range(1, min(T, cap) + 1):
        if T % t == 0:
            best = t
    return best


# ----------------------------------------------------------------------------
# Fused kernel: hoisted input-gate matmul for a Tb block + serial recurrence.
# Grid = (bn tiles [parallel], time blocks [arbitrary, INNERMOST]).
# ----------------------------------------------------------------------------
def _lstm_fused_kernel(cap_ref, img_ref, w_ih_ref, w_hh_ref, b_ref,
                       h_out_ref, h_scr, c_scr, *, hidden_size, t_blk):
    H = hidden_size
    tb = pl.program_id(1)    # time-block axis must stay the innermost grid axis

    @pl.when(tb == 0)
    def _init():
        h_scr[...] = jnp.zeros_like(h_scr)
        c_scr[...] = jnp.zeros_like(c_scr)

    t_dim, bn, E = cap_ref.shape

    # --- hoisted input projection for the whole time block (one big-M matmul)
    # cap + img added in f32 (matches reference), matmul operands in the
    # compute dtype (bf16 on the fast path) with f32 accumulation.
    x = cap_ref[...].astype(jnp.float32) + img_ref[...].astype(jnp.float32)[None, :, :]
    x2 = x.reshape(t_dim * bn, E).astype(w_ih_ref.dtype)
    gx = jnp.dot(x2, w_ih_ref[...], preferred_element_type=jnp.float32) + b_ref[...]
    gx = gx.reshape(t_dim, bn, 4 * H)                       # f32, stays on-chip

    w_hh = w_hh_ref[...]
    h = h_scr[...]
    c = c_scr[...]
    # Serial recurrence over the Tb steps of this block, fully unrolled at
    # trace time (static trip count). Only h @ W_hh + gate math remain here.
    for t in range(t_blk):
        gates = gx[t] + jnp.dot(h.astype(w_hh.dtype), w_hh,
                                preferred_element_type=jnp.float32)
        # PyTorch gate order i, f, g, o; H is a multiple of 128 so these
        # slices are lane-aligned.
        i_g = jax.nn.sigmoid(gates[:, 0 * H:1 * H])
        f_g = jax.nn.sigmoid(gates[:, 1 * H:2 * H])
        g_g = jnp.tanh(gates[:, 2 * H:3 * H])
        o_g = jax.nn.sigmoid(gates[:, 3 * H:4 * H])
        c = f_g * c + i_g * g_g
        h = o_g * jnp.tanh(c)
    h_scr[...] = h
    c_scr[...] = c

    @pl.when(tb == pl.num_programs(1) - 1)
    def _finalize():
        h_out_ref[...] = h.astype(h_out_ref.dtype)


def lstm_forward(cap_tm, img_bn, w_ih_t, w_hh_t, b_gates, *, out_dtype):
    T, BN, E = cap_tm.shape
    G4 = w_ih_t.shape[1]
    H = w_hh_t.shape[0]
    bn_blk = _pick_bn_block(BN)
    t_blk = _pick_t_block(T)
    # Invariant: the time axis is the LAST (fastest) grid axis; h/c scratch
    # state is re-initialized at tb==0 for every bn tile.
    grid = (BN // bn_blk, T // t_blk)
    kernel = functools.partial(_lstm_fused_kernel, hidden_size=H, t_blk=t_blk)
    return pl.pallas_call(
        kernel,
        out_shape=jax.ShapeDtypeStruct((BN, H), out_dtype),
        grid=grid,
        in_specs=[
            pl.BlockSpec((t_blk, bn_blk, E), lambda bn, tb: (tb, bn, 0)),
            pl.BlockSpec((bn_blk, E), lambda bn, tb: (bn, 0)),
            # Grid-invariant weights: constant index_map => DMA'd once.
            # TODO(synk): pipeline_mode=pl.Buffered(1) would halve their VMEM.
            pl.BlockSpec((E, G4), lambda bn, tb: (0, 0)),
            pl.BlockSpec((H, G4), lambda bn, tb: (0, 0)),
            pl.BlockSpec((1, G4), lambda bn, tb: (0, 0)),
        ],
        out_specs=pl.BlockSpec((bn_blk, H), lambda bn, tb: (bn, 0)),
        scratch_shapes=[
            pltpu.VMEM((bn_blk, H), jnp.float32),   # h (f32 state)
            pltpu.VMEM((bn_blk, H), jnp.float32),   # c
        ],
        compiler_params=pltpu.CompilerParams(
            dimension_semantics=("parallel", "arbitrary"),
            vmem_limit_bytes=_VMEM_LIMIT),
    )(cap_tm, img_bn, w_ih_t, w_hh_t, b_gates)


# ----------------------------------------------------------------------------
# Vocab projection: grid = (v outer, bn inner) so each (H, v_blk) weight tile
# streams from HBM exactly once; v_blk is a multiple of 128 (lane-dense stores).
# ----------------------------------------------------------------------------
def _fc_kernel(h_ref, w_ref, b_ref, out_ref):
    out_ref[...] = (
        jnp.dot(h_ref[...], w_ref[...], preferred_element_type=jnp.float32)
        + b_ref[...]
    ).astype(out_ref.dtype)


def vocab_projection(h_last, w_fc_t, b_fc):
    BN, H = h_last.shape
    V = w_fc_t.shape[1]
    bn_blk = _pick_bn_block(BN)
    v_blk = _pick_lane_block(V)
    grid = (V // v_blk, BN // bn_blk)          # v outer, bn inner
    return pl.pallas_call(
        _fc_kernel,
        out_shape=jax.ShapeDtypeStruct((BN, V), jnp.float32),
        grid=grid,
        in_specs=[
            pl.BlockSpec((bn_blk, H), lambda v, bn: (bn, 0)),
            pl.BlockSpec((H, v_blk), lambda v, bn: (0, v)),
            pl.BlockSpec((1, v_blk), lambda v, bn: (0, v)),
        ],
        out_specs=pl.BlockSpec((bn_blk, v_blk), lambda v, bn: (bn, v)),
        compiler_params=pltpu.CompilerParams(
            dimension_semantics=("parallel", "parallel"),
            vmem_limit_bytes=_VMEM_LIMIT),
    )(h_last, w_fc_t, b_fc)


# ----------------------------------------------------------------------------
# Parameter construction (matches nn.Module shapes)
# ----------------------------------------------------------------------------
def init_params(key, vocab_size, feature_size, embed_size, hidden_size):
    ks = jax.random.split(key, 8)
    scale = 0.05
    p = {}
    p["img_w"] = scale * jax.random.normal(ks[0], (embed_size, feature_size), jnp.float32)
    p["img_b"] = scale * jax.random.normal(ks[1], (embed_size,), jnp.float32)
    emb = scale * jax.random.normal(ks[2], (vocab_size, embed_size), jnp.float32)
    p["emb"] = emb.at[0].set(0.0)                       # padding_idx=0
    p["w_ih"] = scale * jax.random.normal(ks[3], (4 * hidden_size, embed_size), jnp.float32)
    p["w_hh"] = scale * jax.random.normal(ks[4], (4 * hidden_size, hidden_size), jnp.float32)
    p["b_ih"] = scale * jax.random.normal(ks[5], (4 * hidden_size,), jnp.float32)
    p["b_hh"] = scale * jax.random.normal(ks[6], (4 * hidden_size,), jnp.float32)
    p["fc_w"] = scale * jax.random.normal(ks[7], (vocab_size, hidden_size), jnp.float32)
    p["fc_b"] = jnp.zeros((vocab_size,), jnp.float32)
    return p


# ----------------------------------------------------------------------------
# Full forward pass
# ----------------------------------------------------------------------------
def image_captioning_forward(params, image_features, captions, *, use_bf16=True):
    B, N, T = captions.shape
    E = params["img_w"].shape[0]
    H = params["w_hh"].shape[1]
    V = params["fc_w"].shape[0]
    BN = B * N
    BN_pad = _round_up(BN, 8)                       # sublane-multiple batch tile
    compute_dtype = jnp.bfloat16 if use_bf16 else jnp.float32

    # Tiny image Linear + embedding gather stay in plain JAX (per review).
    img_emb = image_features @ params["img_w"].T + params["img_b"]        # (B, E)
    img_bn = jnp.broadcast_to(img_emb[:, None, :], (B, N, E)).reshape(BN, E)
    # Embedding gather directly into time-major layout (T, BN, E).
    cap_tm = jnp.take(params["emb"], jnp.transpose(captions, (2, 0, 1)),
                      axis=0).reshape(T, BN, E)

    if BN_pad != BN:                                 # pad batch to multiple of 8
        img_bn = jnp.pad(img_bn, ((0, BN_pad - BN), (0, 0)))
        cap_tm = jnp.pad(cap_tm, ((0, 0), (0, BN_pad - BN), (0, 0)))

    cap_tm = cap_tm.astype(compute_dtype)
    img_bn = img_bn.astype(compute_dtype)
    w_ih_t = params["w_ih"].T.astype(compute_dtype)          # (E, 4H)
    w_hh_t = params["w_hh"].T.astype(compute_dtype)          # (H, 4H)
    w_fc_t = params["fc_w"].T.astype(compute_dtype)          # (H, V)
    b_gates = (params["b_ih"] + params["b_hh"]).reshape(1, 4 * H).astype(jnp.float32)
    b_fc = params["fc_b"].reshape(1, V).astype(jnp.float32)

    h_last = lstm_forward(cap_tm, img_bn, w_ih_t, w_hh_t, b_gates,
                          out_dtype=compute_dtype)            # (BN_pad, H)
    logits = vocab_projection(h_last, w_fc_t, b_fc)           # (BN_pad, V) f32
    return logits[:BN].reshape(B, N, V)


# ----------------------------------------------------------------------------
# Pure-JAX reference (mirrors the PyTorch forward) for verification
# ----------------------------------------------------------------------------
def reference_forward(params, image_features, captions):
    B, N, T = captions.shape
    H = params["w_hh"].shape[1]
    img = image_features @ params["img_w"].T + params["img_b"]
    E = img.shape[-1]
    img = jnp.broadcast_to(img[:, None, None, :], (B, N, T, E)).reshape(B * N, T, E)
    cap = jnp.take(params["emb"], captions, axis=0).reshape(B * N, T, E)
    x = img + cap
    h = jnp.zeros((B * N, H), jnp.float32)
    c = jnp.zeros((B * N, H), jnp.float32)
    for t in range(T):
        gates = x[:, t, :] @ params["w_ih"].T + params["b_ih"] \
            + h @ params["w_hh"].T + params["b_hh"]
        i = jax.nn.sigmoid(gates[:, 0 * H:1 * H])
        f = jax.nn.sigmoid(gates[:, 1 * H:2 * H])
        g = jnp.tanh(gates[:, 2 * H:3 * H])
        o = jax.nn.sigmoid(gates[:, 3 * H:4 * H])
        c = f * c + i * g
        h = o * jnp.tanh(c)
    out = h @ params["fc_w"].T + params["fc_b"]
    return out.reshape(B, N, -1)


if __name__ == "__main__":
    # Small shapes consistent with the module; H, E, 4H, V are multiples of 128
    # so gate slices / stores are lane-aligned. BN = 6 gets padded to 8.
    B, N, T = 2, 3, 8
    vocab_size, feature_size, embed_size, hidden_size = 512, 256, 128, 128

    key = jax.random.PRNGKey(0)
    k_param, k_img, k_cap = jax.random.split(key, 3)

    params = init_params(k_param, vocab_size, feature_size, embed_size, hidden_size)
    image_features = jax.random.normal(k_img, (B, feature_size), jnp.float32)
    captions = jax.random.randint(k_cap, (B, N, T), 0, vocab_size, dtype=jnp.int32)

    ref = reference_forward(params, image_features, captions)

    # f32 path (tight correctness check).
    fwd_f32 = jax.jit(functools.partial(image_captioning_forward, use_bf16=False))
    out = jax.block_until_ready(fwd_f32(params, image_features, captions))
    assert out.shape == (B, N, vocab_size)
    assert jnp.allclose(out, ref, atol=1e-4, rtol=1e-4), "f32 mismatch vs reference"

    # bf16 matmul-operand path (default; valid on v5e/v6e/v7x — gate math,
    # accumulation and h/c state stay f32, and cap+img are summed in f32).
    fwd_bf16 = jax.jit(functools.partial(image_captioning_forward, use_bf16=True))
    out_bf16 = jax.block_until_ready(fwd_bf16(params, image_features, captions))
    assert out_bf16.shape == (B, N, vocab_size)
    assert float(jnp.max(jnp.abs(out_bf16.astype(jnp.float32) - ref))) < 5e-2, \
        "bf16 path too far from reference"

    print("KERNEL_OK")
</pallas_src>

<mosaic_0001>
module attributes {stable_mosaic.version = 11 : i64} {
  func.func @_fc_kernel(%arg0: i32, %arg1: i32, %arg2: memref<8x128xf32, #tpu.memory_space<vmem>>, %arg3: memref<128x512xf32, #tpu.memory_space<vmem>>, %arg4: memref<1x512xf32, #tpu.memory_space<vmem>>, %arg5: memref<8x512xf32, #tpu.memory_space<vmem>>) attributes {dimension_semantics = [#tpu.dimension_semantics<parallel>, #tpu.dimension_semantics<parallel>], iteration_bounds = array<i64: 1, 1>, scalar_prefetch = 0 : i64, scratch_operands = 0 : i64, tpu.core_type = #tpu.core_type<tc>, window_params = [{transform_indices = @transform_0, window_bounds = array<i64: 8, 128>}, {transform_indices = @transform_1, window_bounds = array<i64: 128, 512>}, {transform_indices = @transform_2, window_bounds = array<i64: 1, 512>}, {transform_indices = @transform_3, window_bounds = array<i64: 8, 512>}]} {
    %c0 = arith.constant 0 : index
    %c0_0 = arith.constant 0 : index
    %0 = vector.load %arg2[%c0, %c0_0] : memref<8x128xf32, #tpu.memory_space<vmem>>, vector<8x128xf32>
    %c0_1 = arith.constant 0 : index
    %c0_2 = arith.constant 0 : index
    %1 = vector.load %arg3[%c0_1, %c0_2] : memref<128x512xf32, #tpu.memory_space<vmem>>, vector<128x512xf32>
    %cst = arith.constant dense<0.000000e+00> : vector<8x512xf32>
    %2 = tpu.matmul %0, %1, %cst {dimension_numbers = #tpu.dot_dimension_numbers<[1], [0], [0], [1], [0, 0, 1, 1], [], []>} : vector<8x128xf32>, vector<128x512xf32>, vector<8x512xf32> -> vector<8x512xf32>
    %c0_3 = arith.constant 0 : index
    %c0_4 = arith.constant 0 : index
    %3 = vector.load %arg4[%c0_3, %c0_4] : memref<1x512xf32, #tpu.memory_space<vmem>>, vector<1x512xf32>
    %4 = vector.broadcast %3 : vector<1x512xf32> to vector<8x512xf32>
    %5 = arith.addf %2, %4 : vector<8x512xf32>
    %c0_5 = arith.constant 0 : index
    %c0_6 = arith.constant 0 : index
    %6 = vector.load %arg5[%c0_5, %c0_6] : memref<8x512xf32, #tpu.memory_space<vmem>>, vector<8x512xf32>
    tpu.vector_store %arg5[%c0_5, %c0_6], %5 {strides = array<i32>} : memref<8x512xf32, #tpu.memory_space<vmem>>, vector<8x512xf32>,
    return
  }
  func.func @transform_0(%arg0: i32, %arg1: i32) -> (i32, i32) {
    %c0_i32 = arith.constant 0 : i32
    %c0_i32_0 = arith.constant 0 : i32
    return %arg1, %c0_i32 : i32, i32
  }
  func.func @transform_1(%arg0: i32, %arg1: i32) -> (i32, i32) {
    %c0_i32 = arith.constant 0 : i32
    %c0_i32_0 = arith.constant 0 : i32
    return %c0_i32, %arg0 : i32, i32
  }
  func.func @transform_2(%arg0: i32, %arg1: i32) -> (i32, i32) {
    %c0_i32 = arith.constant 0 : i32
    %c0_i32_0 = arith.constant 0 : i32
    return %c0_i32, %arg0 : i32, i32
  }
  func.func @transform_3(%arg0: i32, %arg1: i32) -> (i32, i32) {
    %c0_i32 = arith.constant 0 : i32
    return %arg1, %arg0 : i32, i32
  }
}

module attributes {stable_mosaic.version = 11 : i64} {
  func.func @_lstm_fused_kernel(%arg0: i32, %arg1: i32, %arg2: memref<8x8x128xf32, #tpu.memory_space<vmem>>, %arg3: memref<8x128xf32, #tpu.memory_space<vmem>>, %arg4: memref<128x512xf32, #tpu.memory_space<vmem>>, %arg5: memref<128x512xf32, #tpu.memory_space<vmem>>, %arg6: memref<1x512xf32, #tpu.memory_space<vmem>>, %arg7: memref<8x128xf32, #tpu.memory_space<vmem>>, %arg8: memref<8x128xf32, #tpu.memory_space<vmem>>, %arg9: memref<8x128xf32, #tpu.memory_space<vmem>>) attributes {dimension_semantics = [#tpu.dimension_semantics<parallel>, #tpu.dimension_semantics<arbitrary>], iteration_bounds = array<i64: 1, 1>, scalar_prefetch = 0 : i64, scratch_operands = 2 : i64, tpu.core_type = #tpu.core_type<tc>, window_params = [{transform_indices = @transform_0, window_bounds = array<i64: 8, 8, 128>}, {transform_indices = @transform_1, window_bounds = array<i64: 8, 128>}, {pipeline_mode = #tpu.pipeline_mode<synchronous>, transform_indices = @transform_2, window_bounds = array<i64: 128, 512>}, {pipeline_mode = #tpu.pipeline_mode<synchronous>, transform_indices = @transform_3, window_bounds = array<i64: 128, 512>}, {pipeline_mode = #tpu.pipeline_mode<synchronous>, transform_indices = @transform_4, window_bounds = array<i64: 1, 512>}, {transform_indices = @transform_5, window_bounds = array<i64: 8, 128>}]} {
    %c0_i32 = arith.constant 0 : i32
    %0 = arith.cmpi eq, %arg1, %c0_i32 : i32
    %1 = arith.extui %0 : i1 to i32
    %c0_i32_0 = arith.constant 0 : i32
    %2 = arith.cmpi ne, %1, %c0_i32_0 : i32
    scf.if %2 {
      %cst_53 = arith.constant 0.000000e+00 : f32
      %255 = vector.broadcast %cst_53 : f32 to vector<8x128xf32>
      %c0_54 = arith.constant 0 : index
      %c0_55 = arith.constant 0 : index
      %256 = vector.load %arg8[%c0_54, %c0_55] : memref<8x128xf32, #tpu.memory_space<vmem>>, vector<8x128xf32>
      tpu.vector_store %arg8[%c0_54, %c0_55], %255 {strides = array<i32>} : memref<8x128xf32, #tpu.memory_space<vmem>>, vector<8x128xf32>,
      %cst_56 = arith.constant 0.000000e+00 : f32
      %257 = vector.broadcast %cst_56 : f32 to vector<8x128xf32>
      %c0_57 = arith.constant 0 : index
      %c0_58 = arith.constant 0 : index
      %258 = vector.load %arg9[%c0_57, %c0_58] : memref<8x128xf32, #tpu.memory_space<vmem>>, vector<8x128xf32>
      tpu.vector_store %arg9[%c0_57, %c0_58], %257 {strides = array<i32>} : memref<8x128xf32, #tpu.memory_space<vmem>>, vector<8x128xf32>,
    } else {
    }
    %c0 = arith.constant 0 : index
    %c0_1 = arith.constant 0 : index
    %c0_2 = arith.constant 0 : index
    %3 = vector.load %arg2[%c0, %c0_1, %c0_2] : memref<8x8x128xf32, #tpu.memory_space<vmem>>, vector<8x8x128xf32>
    %c0_3 = arith.constant 0 : index
    %c0_4 = arith.constant 0 : index
    %4 = vector.load %arg3[%c0_3, %c0_4] : memref<8x128xf32, #tpu.memory_space<vmem>>, vector<8x128xf32>
    %5 = vector.shape_cast %4 : vector<8x128xf32> to vector<1x8x128xf32>
    %6 = vector.broadcast %5 : vector<1x8x128xf32> to vector<8x8x128xf32>
    %7 = arith.addf %3, %6 : vector<8x8x128xf32>
    %8 = vector.shape_cast %7 : vector<8x8x128xf32> to vector<64x128xf32>
    %c0_5 = arith.constant 0 : index
    %c0_6 = arith.constant 0 : index
    %9 = vector.load %arg4[%c0_5, %c0_6] : memref<128x512xf32, #tpu.memory_space<vmem>>, vector<128x512xf32>
    %cst = arith.constant dense<0.000000e+00> : vector<64x512xf32>
    %10 = tpu.matmul %8, %9, %cst {dimension_numbers = #tpu.dot_dimension_numbers<[1], [0], [0], [1], [0, 0, 1, 1], [], []>} : vector<64x128xf32>, vector<128x512xf32>, vector<64x512xf32> -> vector<64x512xf32>
    %c0_7 = arith.constant 0 : index
    %c0_8 = arith.constant 0 : index
    %11 = vector.load %arg6[%c0_7, %c0_8] : memref<1x512xf32, #tpu.memory_space<vmem>>, vector<1x512xf32>
    %12 = vector.broadcast %11 : vector<1x512xf32> to vector<64x512xf32>
    %13 = arith.addf %10, %12 : vector<64x512xf32>
    %14 = vector.shape_cast %13 : vector<64x512xf32> to vector<8x8x512xf32>
    %c0_9 = arith.constant 0 : index
    %c0_10 = arith.constant 0 : index
    %15 = vector.load %arg5[%c0_9, %c0_10] : memref<128x512xf32, #tpu.memory_space<vmem>>, vector<128x512xf32>
    %c0_11 = arith.constant 0 : index
    %c0_12 = arith.constant 0 : index
    %16 = vector.load %arg8[%c0_11, %c0_12] : memref<8x128xf32, #tpu.memory_space<vmem>>, vector<8x128xf32>
    %c0_13 = arith.constant 0 : index
    %c0_14 = arith.constant 0 : index
    %17 = vector.load %arg9[%c0_13, %c0_14] : memref<8x128xf32, #tpu.memory_space<vmem>>, vector<8x128xf32>
    %18 = vector.extract_strided_slice %14 {offsets = [0, 0, 0], sizes = [1, 8, 512], strides = [1, 1, 1]} : vector<8x8x512xf32> to vector<1x8x512xf32>
    %19 = vector.shape_cast %18 : vector<1x8x512xf32> to vector<8x512xf32>
    %cst_15 = arith.constant dense<0.000000e+00> : vector<8x512xf32>
    %20 = tpu.matmul %16, %15, %cst_15 {dimension_numbers = #tpu.dot_dimension_numbers<[1], [0], [0], [1], [0, 0, 1, 1], [], []>} : vector<8x128xf32>, vector<128x512xf32>, vector<8x512xf32> -> vector<8x512xf32>
    %21 = arith.addf %19, %20 : vector<8x512xf32>
    %22 = vector.extract_strided_slice %21 {offsets = [0, 0], sizes = [8, 128], strides = [1, 1]} : vector<8x512xf32> to vector<8x128xf32>
    %23 = arith.negf %22 : vector<8x128xf32>
    %24 = math.exp %23 : vector<8x128xf32>
    %cst_16 = arith.constant 1.000000e+00 : f32
    %25 = vector.broadcast %cst_16 : f32 to vector<8x128xf32>
    %26 = arith.addf %25, %24 : vector<8x128xf32>
    %27 = arith.divf %25, %26 : vector<8x128xf32>
    %28 = vector.extract_strided_slice %21 {offsets = [0, 128], sizes = [8, 128], strides = [1, 1]} : vector<8x512xf32> to vector<8x128xf32>
    %29 = arith.negf %28 : vector<8x128xf32>
    %30 = math.exp %29 : vector<8x128xf32>
    %cst_17 = arith.constant 1.000000e+00 : f32
    %31 = vector.broadcast %cst_17 : f32 to vector<8x128xf32>
    %32 = arith.addf %31, %30 : vector<8x128xf32>
    %33 = arith.divf %31, %32 : vector<8x128xf32>
    %34 = vector.extract_strided_slice %21 {offsets = [0, 256], sizes = [8, 128], strides = [1, 1]} : vector<8x512xf32> to vector<8x128xf32>
    %35 = math.tanh %34 : vector<8x128xf32>
    %36 = vector.extract_strided_slice %21 {offsets = [0, 384], sizes = [8, 128], strides = [1, 1]} : vector<8x512xf32> to vector<8x128xf32>
    %37 = arith.negf %36 : vector<8x128xf32>
    %38 = math.exp %37 : vector<8x128xf32>
    %cst_18 = arith.constant 1.000000e+00 : f32
    %39 = vector.broadcast %cst_18 : f32 to vector<8x128xf32>
    %40 = arith.addf %39, %38 : vector<8x128xf32>
    %41 = arith.divf %39, %40 : vector<8x128xf32>
    %42 = arith.mulf %33, %17 : vector<8x128xf32>
    %43 = arith.mulf %27, %35 : vector<8x128xf32>
    %44 = arith.addf %42, %43 : vector<8x128xf32>
    %45 = math.tanh %44 : vector<8x128xf32>
    %46 = arith.mulf %41, %45 : vector<8x128xf32>
    %47 = vector.extract_strided_slice %14 {offsets = [1, 0, 0], sizes = [1, 8, 512], strides = [1, 1, 1]} : vector<8x8x512xf32> to vector<1x8x512xf32>
    %48 = vector.shape_cast %47 : vector<1x8x512xf32> to vector<8x512xf32>
    %cst_19 = arith.constant dense<0.000000e+00> : vector<8x512xf32>
    %49 = tpu.matmul %46, %15, %cst_19 {dimension_numbers = #tpu.dot_dimension_numbers<[1], [0], [0], [1], [0, 0, 1, 1], [], []>} : vector<8x128xf32>, vector<128x512xf32>, vector<8x512xf32> -> vector<8x512xf32>
    %50 = arith.addf %48, %49 : vector<8x512xf32>
    %51 = vector.extract_strided_slice %50 {offsets = [0, 0], sizes = [8, 128], strides = [1, 1]} : vector<8x512xf32> to vector<8x128xf32>
    %52 = arith.negf %51 : vector<8x128xf32>
    %53 = math.exp %52 : vector<8x128xf32>
    %cst_20 = arith.constant 1.000000e+00 : f32
    %54 = vector.broadcast %cst_20 : f32 to vector<8x128xf32>
    %55 = arith.addf %54, %53 : vector<8x128xf32>
    %56 = arith.divf %54, %55 : vector<8x128xf32>
    %57 = vector.extract_strided_slice %50 {offsets = [0, 128], sizes = [8, 128], strides = [1, 1]} : vector<8x512xf32> to vector<8x128xf32>
    %58 = arith.negf %57 : vector<8x128xf32>
    %59 = math.exp %58 : vector<8x128xf32>
    %cst_21 = arith.constant 1.000000e+00 : f32
    %60 = vector.broadcast %cst_21 : f32 to vector<8x128xf32>
    %61 = arith.addf %60, %59 : vector<8x128xf32>
    %62 = arith.divf %60, %61 : vector<8x128xf32>
    %63 = vector.extract_strided_slice %50 {offsets = [0, 256], sizes = [8, 128], strides = [1, 1]} : vector<8x512xf32> to vector<8x128xf32>
    %64 = math.tanh %63 : vector<8x128xf32>
    %65 = vector.extract_strided_slice %50 {offsets = [0, 384], sizes = [8, 128], strides = [1, 1]} : vector<8x512xf32> to vector<8x128xf32>
    %66 = arith.negf %65 : vector<8x128xf32>
    %67 = math.exp %66 : vector<8x128xf32>
    %cst_22 = arith.constant 1.000000e+00 : f32
    %68 = vector.broadcast %cst_22 : f32 to vector<8x128xf32>
    %69 = arith.addf %68, %67 : vector<8x128xf32>
    %70 = arith.divf %68, %69 : vector<8x128xf32>
    %71 = arith.mulf %62, %44 : vector<8x128xf32>
    %72 = arith.mulf %56, %64 : vector<8x128xf32>
    %73 = arith.addf %71, %72 : vector<8x128xf32>
    %74 = math.tanh %73 : vector<8x128xf32>
    %75 = arith.mulf %70, %74 : vector<8x128xf32>
    %76 = vector.extract_strided_slice %14 {offsets = [2, 0, 0], sizes = [1, 8, 512], strides = [1, 1, 1]} : vector<8x8x512xf32> to vector<1x8x512xf32>
    %77 = vector.shape_cast %76 : vector<1x8x512xf32> to vector<8x512xf32>
    %cst_23 = arith.constant dense<0.000000e+00> : vector<8x512xf32>
    %78 = tpu.matmul %75, %15, %cst_23 {dimension_numbers = #tpu.dot_dimension_numbers<[1], [0], [0], [1], [0, 0, 1, 1], [], []>} : vector<8x128xf32>, vector<128x512xf32>, vector<8x512xf32> -> vector<8x512xf32>
    %79 = arith.addf %77, %78 : vector<8x512xf32>
    %80 = vector.extract_strided_slice %79 {offsets = [0, 0], sizes = [8, 128], strides = [1, 1]} : vector<8x512xf32> to vector<8x128xf32>
    %81 = arith.negf %80 : vector<8x128xf32>
    %82 = math.exp %81 : vector<8x128xf32>
    %cst_24 = arith.constant 1.000000e+00 : f32
    %83 = vector.broadcast %cst_24 : f32 to vector<8x128xf32>
    %84 = arith.addf %83, %82 : vector<8x128xf32>
    %85 = arith.divf %83, %84 : vector<8x128xf32>
    %86 = vector.extract_strided_slice %79 {offsets = [0, 128], sizes = [8, 128], strides = [1, 1]} : vector<8x512xf32> to vector<8x128xf32>
    %87 = arith.negf %86 : vector<8x128xf32>
    %88 = math.exp %87 : vector<8x128xf32>
    %cst_25 = arith.constant 1.000000e+00 : f32
    %89 = vector.broadcast %cst_25 : f32 to vector<8x128xf32>
    %90 = arith.addf %89, %88 : vector<8x128xf32>
    %91 = arith.divf %89, %90 : vector<8x128xf32>
    %92 = vector.extract_strided_slice %79 {offsets = [0, 256], sizes = [8, 128], strides = [1, 1]} : vector<8x512xf32> to vector<8x128xf32>
    %93 = math.tanh %92 : vector<8x128xf32>
    %94 = vector.extract_strided_slice %79 {offsets = [0, 384], sizes = [8, 128], strides = [1, 1]} : vector<8x512xf32> to vector<8x128xf32>
    %95 = arith.negf %94 : vector<8x128xf32>
    %96 = math.exp %95 : vector<8x128xf32>
    %cst_26 = arith.constant 1.000000e+00 : f32
    %97 = vector.broadcast %cst_26 : f32 to vector<8x128xf32>
    %98 = arith.addf %97, %96 : vector<8x128xf32>
    %99 = arith.divf %97, %98 : vector<8x128xf32>
    %100 = arith.mulf %91, %73 : vector<8x128xf32>
    %101 = arith.mulf %85, %93 : vector<8x128xf32>
    %102 = arith.addf %100, %101 : vector<8x128xf32>
    %103 = math.tanh %102 : vector<8x128xf32>
    %104 = arith.mulf %99, %103 : vector<8x128xf32>
    %105 = vector.extract_strided_slice %14 {offsets = [3, 0, 0], sizes = [1, 8, 512], strides = [1, 1, 1]} : vector<8x8x512xf32> to vector<1x8x512xf32>
    %106 = vector.shape_cast %105 : vector<1x8x512xf32> to vector<8x512xf32>
    %cst_27 = arith.constant dense<0.000000e+00> : vector<8x512xf32>
    %107 = tpu.matmul %104, %15, %cst_27 {dimension_numbers = #tpu.dot_dimension_numbers<[1], [0], [0], [1], [0, 0, 1, 1], [], []>} : vector<8x128xf32>, vector<128x512xf32>, vector<8x512xf32> -> vector<8x512xf32>
    %108 = arith.addf %106, %107 : vector<8x512xf32>
    %109 = vector.extract_strided_slice %108 {offsets = [0, 0], sizes = [8, 128], strides = [1, 1]} : vector<8x512xf32> to vector<8x128xf32>
    %110 = arith.negf %109 : vector<8x128xf32>
    %111 = math.exp %110 : vector<8x128xf32>
    %cst_28 = arith.constant 1.000000e+00 : f32
    %112 = vector.broadcast %cst_28 : f32 to vector<8x128xf32>
    %113 = arith.addf %112, %111 : vector<8x128xf32>
    %114 = arith.divf %112, %113 : vector<8x128xf32>
    %115 = vector.extract_strided_slice %108 {offsets = [0, 128], sizes = [8, 128], strides = [1, 1]} : vector<8x512xf32> to vector<8x128xf32>
    %116 = arith.negf %115 : vector<8x128xf32>
    %117 = math.exp %116 : vector<8x128xf32>
    %cst_29 = arith.constant 1.000000e+00 : f32
    %118 = vector.broadcast %cst_29 : f32 to vector<8x128xf32>
    %119 = arith.addf %118, %117 : vector<8x128xf32>
    %120 = arith.divf %118, %119 : vector<8x128xf32>
    %121 = vector.extract_strided_slice %108 {offsets = [0, 256], sizes = [8, 128], strides = [1, 1]} : vector<8x512xf32> to vector<8x128xf32>
    %122 = math.tanh %121 : vector<8x128xf32>
    %123 = vector.extract_strided_slice %108 {offsets = [0, 384], sizes = [8, 128], strides = [1, 1]} : vector<8x512xf32> to vector<8x128xf32>
    %124 = arith.negf %123 : vector<8x128xf32>
    %125 = math.exp %124 : vector<8x128xf32>
    %cst_30 = arith.constant 1.000000e+00 : f32
    %126 = vector.broadcast %cst_30 : f32 to vector<8x128xf32>
    %127 = arith.addf %126, %125 : vector<8x128xf32>
    %128 = arith.divf %126, %127 : vector<8x128xf32>
    %129 = arith.mulf %120, %102 : vector<8x128xf32>
    %130 = arith.mulf %114, %122 : vector<8x128xf32>
    %131 = arith.addf %129, %130 : vector<8x128xf32>
    %132 = math.tanh %131 : vector<8x128xf32>
    %133 = arith.mulf %128, %132 : vector<8x128xf32>
    %134 = vector.extract_strided_slice %14 {offsets = [4, 0, 0], sizes = [1, 8, 512], strides = [1, 1, 1]} : vector<8x8x512xf32> to vector<1x8x512xf32>
    %135 = vector.shape_cast %134 : vector<1x8x512xf32> to vector<8x512xf32>
    %cst_31 = arith.constant dense<0.000000e+00> : vector<8x512xf32>
    %136 = tpu.matmul %133, %15, %cst_31 {dimension_numbers = #tpu.dot_dimension_numbers<[1], [0], [0], [1], [0, 0, 1, 1], [], []>} : vector<8x128xf32>, vector<128x512xf32>, vector<8x512xf32> -> vector<8x512xf32>
    %137 = arith.addf %135, %136 : vector<8x512xf32>
    %138 = vector.extract_strided_slice %137 {offsets = [0, 0], sizes = [8, 128], strides = [1, 1]} : vector<8x512xf32> to vector<8x128xf32>
    %139 = arith.negf %138 : vector<8x128xf32>
    %140 = math.exp %139 : vector<8x128xf32>
    %cst_32 = arith.constant 1.000000e+00 : f32
    %141 = vector.broadcast %cst_32 : f32 to vector<8x128xf32>
    %142 = arith.addf %141, %140 : vector<8x128xf32>
    %143 = arith.divf %141, %142 : vector<8x128xf32>
    %144 = vector.extract_strided_slice %137 {offsets = [0, 128], sizes = [8, 128], strides = [1, 1]} : vector<8x512xf32> to vector<8x128xf32>
    %145 = arith.negf %144 : vector<8x128xf32>
    %146 = math.exp %145 : vector<8x128xf32>
    %cst_33 = arith.constant 1.000000e+00 : f32
    %147 = vector.broadcast %cst_33 : f32 to vector<8x128xf32>
    %148 = arith.addf %147, %146 : vector<8x128xf32>
    %149 = arith.divf %147, %148 : vector<8x128xf32>
    %150 = vector.extract_strided_slice %137 {offsets = [0, 256], sizes = [8, 128], strides = [1, 1]} : vector<8x512xf32> to vector<8x128xf32>
    %151 = math.tanh %150 : vector<8x128xf32>
    %152 = vector.extract_strided_slice %137 {offsets = [0, 384], sizes = [8, 128], strides = [1, 1]} : vector<8x512xf32> to vector<8x128xf32>
    %153 = arith.negf %152 : vector<8x128xf32>
    %154 = math.exp %153 : vector<8x128xf32>
    %cst_34 = arith.constant 1.000000e+00 : f32
    %155 = vector.broadcast %cst_34 : f32 to vector<8x128xf32>
    %156 = arith.addf %155, %154 : vector<8x128xf32>
    %157 = arith.divf %155, %156 : vector<8x128xf32>
    %158 = arith.mulf %149, %131 : vector<8x128xf32>
    %159 = arith.mulf %143, %151 : vector<8x128xf32>
    %160 = arith.addf %158, %159 : vector<8x128xf32>
    %161 = math.tanh %160 : vector<8x128xf32>
    %162 = arith.mulf %157, %161 : vector<8x128xf32>
    %163 = vector.extract_strided_slice %14 {offsets = [5, 0, 0], sizes = [1, 8, 512], strides = [1, 1, 1]} : vector<8x8x512xf32> to vector<1x8x512xf32>
    %164 = vector.shape_cast %163 : vector<1x8x512xf32> to vector<8x512xf32>
    %cst_35 = arith.constant dense<0.000000e+00> : vector<8x512xf32>
    %165 = tpu.matmul %162, %15, %cst_35 {dimension_numbers = #tpu.dot_dimension_numbers<[1], [0], [0], [1], [0, 0, 1, 1], [], []>} : vector<8x128xf32>, vector<128x512xf32>, vector<8x512xf32> -> vector<8x512xf32>
    %166 = arith.addf %164, %165 : vector<8x512xf32>
    %167 = vector.extract_strided_slice %166 {offsets = [0, 0], sizes = [8, 128], strides = [1, 1]} : vector<8x512xf32> to vector<8x128xf32>
    %168 = arith.negf %167 : vector<8x128xf32>
    %169 = math.exp %168 : vector<8x128xf32>
    %cst_36 = arith.constant 1.000000e+00 : f32
    %170 = vector.broadcast %cst_36 : f32 to vector<8x128xf32>
    %171 = arith.addf %170, %169 : vector<8x128xf32>
    %172 = arith.divf %170, %171 : vector<8x128xf32>
    %173 = vector.extract_strided_slice %166 {offsets = [0, 128], sizes = [8, 128], strides = [1, 1]} : vector<8x512xf32> to vector<8x128xf32>
    %174 = arith.negf %173 : vector<8x128xf32>
    %175 = math.exp %174 : vector<8x128xf32>
    %cst_37 = arith.constant 1.000000e+00 : f32
    %176 = vector.broadcast %cst_37 : f32 to vector<8x128xf32>
    %177 = arith.addf %176, %175 : vector<8x128xf32>
    %178 = arith.divf %176, %177 : vector<8x128xf32>
    %179 = vector.extract_strided_slice %166 {offsets = [0, 256], sizes = [8, 128], strides = [1, 1]} : vector<8x512xf32> to vector<8x128xf32>
    %180 = math.tanh %179 : vector<8x128xf32>
    %181 = vector.extract_strided_slice %166 {offsets = [0, 384], sizes = [8, 128], strides = [1, 1]} : vector<8x512xf32> to vector<8x128xf32>
    %182 = arith.negf %181 : vector<8x128xf32>
    %183 = math.exp %182 : vector<8x128xf32>
    %cst_38 = arith.constant 1.000000e+00 : f32
    %184 = vector.broadcast %cst_38 : f32 to vector<8x128xf32>
    %185 = arith.addf %184, %183 : vector<8x128xf32>
    %186 = arith.divf %184, %185 : vector<8x128xf32>
    %187 = arith.mulf %178, %160 : vector<8x128xf32>
    %188 = arith.mulf %172, %180 : vector<8x128xf32>
    %189 = arith.addf %187, %188 : vector<8x128xf32>
    %190 = math.tanh %189 : vector<8x128xf32>
    %191 = arith.mulf %186, %190 : vector<8x128xf32>
    %192 = vector.extract_strided_slice %14 {offsets = [6, 0, 0], sizes = [1, 8, 512], strides = [1, 1, 1]} : vector<8x8x512xf32> to vector<1x8x512xf32>
    %193 = vector.shape_cast %192 : vector<1x8x512xf32> to vector<8x512xf32>
    %cst_39 = arith.constant dense<0.000000e+00> : vector<8x512xf32>
    %194 = tpu.matmul %191, %15, %cst_39 {dimension_numbers = #tpu.dot_dimension_numbers<[1], [0], [0], [1], [0, 0, 1, 1], [], []>} : vector<8x128xf32>, vector<128x512xf32>, vector<8x512xf32> -> vector<8x512xf32>
    %195 = arith.addf %193, %194 : vector<8x512xf32>
    %196 = vector.extract_strided_slice %195 {offsets = [0, 0], sizes = [8, 128], strides = [1, 1]} : vector<8x512xf32> to vector<8x128xf32>
    %197 = arith.negf %196 : vector<8x128xf32>
    %198 = math.exp %197 : vector<8x128xf32>
    %cst_40 = arith.constant 1.000000e+00 : f32
    %199 = vector.broadcast %cst_40 : f32 to vector<8x128xf32>
    %200 = arith.addf %199, %198 : vector<8x128xf32>
    %201 = arith.divf %199, %200 : vector<8x128xf32>
    %202 = vector.extract_strided_slice %195 {offsets = [0, 128], sizes = [8, 128], strides = [1, 1]} : vector<8x512xf32> to vector<8x128xf32>
    %203 = arith.negf %202 : vector<8x128xf32>
    %204 = math.exp %203 : vector<8x128xf32>
    %cst_41 = arith.constant 1.000000e+00 : f32
    %205 = vector.broadcast %cst_41 : f32 to vector<8x128xf32>
    %206 = arith.addf %205, %204 : vector<8x128xf32>
    %207 = arith.divf %205, %206 : vector<8x128xf32>
    %208 = vector.extract_strided_slice %195 {offsets = [0, 256], sizes = [8, 128], strides = [1, 1]} : vector<8x512xf32> to vector<8x128xf32>
    %209 = math.tanh %208 : vector<8x128xf32>
    %210 = vector.extract_strided_slice %195 {offsets = [0, 384], sizes = [8, 128], strides = [1, 1]} : vector<8x512xf32> to vector<8x128xf32>
    %211 = arith.negf %210 : vector<8x128xf32>
    %212 = math.exp %211 : vector<8x128xf32>
    %cst_42 = arith.constant 1.000000e+00 : f32
    %213 = vector.broadcast %cst_42 : f32 to vector<8x128xf32>
    %214 = arith.addf %213, %212 : vector<8x128xf32>
    %215 = arith.divf %213, %214 : vector<8x128xf32>
    %216 = arith.mulf %207, %189 : vector<8x128xf32>
    %217 = arith.mulf %201, %209 : vector<8x128xf32>
    %218 = arith.addf %216, %217 : vector<8x128xf32>
    %219 = math.tanh %218 : vector<8x128xf32>
    %220 = arith.mulf %215, %219 : vector<8x128xf32>
    %221 = vector.extract_strided_slice %14 {offsets = [7, 0, 0], sizes = [1, 8, 512], strides = [1, 1, 1]} : vector<8x8x512xf32> to vector<1x8x512xf32>
    %222 = vector.shape_cast %221 : vector<1x8x512xf32> to vector<8x512xf32>
    %cst_43 = arith.constant dense<0.000000e+00> : vector<8x512xf32>
    %223 = tpu.matmul %220, %15, %cst_43 {dimension_numbers = #tpu.dot_dimension_numbers<[1], [0], [0], [1], [0, 0, 1, 1], [], []>} : vector<8x128xf32>, vector<128x512xf32>, vector<8x512xf32> -> vector<8x512xf32>
    %224 = arith.addf %222, %223 : vector<8x512xf32>
    %225 = vector.extract_strided_slice %224 {offsets = [0, 0], sizes = [8, 128], strides = [1, 1]} : vector<8x512xf32> to vector<8x128xf32>
    %226 = arith.negf %225 : vector<8x128xf32>
    %227 = math.exp %226 : vector<8x128xf32>
    %cst_44 = arith.constant 1.000000e+00 : f32
    %228 = vector.broadcast %cst_44 : f32 to vector<8x128xf32>
    %229 = arith.addf %228, %227 : vector<8x128xf32>
    %230 = arith.divf %228, %229 : vector<8x128xf32>
    %231 = vector.extract_strided_slice %224 {offsets = [0, 128], sizes = [8, 128], strides = [1, 1]} : vector<8x512xf32> to vector<8x128xf32>
    %232 = arith.negf %231 : vector<8x128xf32>
    %233 = math.exp %232 : vector<8x128xf32>
    %cst_45 = arith.constant 1.000000e+00 : f32
    %234 = vector.broadcast %cst_45 : f32 to vector<8x128xf32>
    %235 = arith.addf %234, %233 : vector<8x128xf32>
    %236 = arith.divf %234, %235 : vector<8x128xf32>
    %237 = vector.extract_strided_slice %224 {offsets = [0, 256], sizes = [8, 128], strides = [1, 1]} : vector<8x512xf32> to vector<8x128xf32>
    %238 = math.tanh %237 : vector<8x128xf32>
    %239 = vector.extract_strided_slice %224 {offsets = [0, 384], sizes = [8, 128], strides = [1, 1]} : vector<8x512xf32> to vector<8x128xf32>
    %240 = arith.negf %239 : vector<8x128xf32>
    %241 = math.exp %240 : vector<8x128xf32>
    %cst_46 = arith.constant 1.000000e+00 : f32
    %242 = vector.broadcast %cst_46 : f32 to vector<8x128xf32>
    %243 = arith.addf %242, %241 : vector<8x128xf32>
    %244 = arith.divf %242, %243 : vector<8x128xf32>
    %245 = arith.mulf %236, %218 : vector<8x128xf32>
    %246 = arith.mulf %230, %238 : vector<8x128xf32>
    %247 = arith.addf %245, %246 : vector<8x128xf32>
    %248 = math.tanh %247 : vector<8x128xf32>
    %249 = arith.mulf %244, %248 : vector<8x128xf32>
    %c0_47 = arith.constant 0 : index
    %c0_48 = arith.constant 0 : index
    %250 = vector.load %arg8[%c0_47, %c0_48] : memref<8x128xf32, #tpu.memory_space<vmem>>, vector<8x128xf32>
    tpu.vector_store %arg8[%c0_47, %c0_48], %249 {strides = array<i32>} : memref<8x128xf32, #tpu.memory_space<vmem>>, vector<8x128xf32>,
    %c0_49 = arith.constant 0 : index
    %c0_50 = arith.constant 0 : index
    %251 = vector.load %arg9[%c0_49, %c0_50] : memref<8x128xf32, #tpu.memory_space<vmem>>, vector<8x128xf32>
    tpu.vector_store %arg9[%c0_49, %c0_50], %247 {strides = array<i32>} : memref<8x128xf32, #tpu.memory_space<vmem>>, vector<8x128xf32>,
    %c0_i32_51 = arith.constant 0 : i32
    %252 = arith.cmpi eq, %arg1, %c0_i32_51 : i32
    %253 = arith.extui %252 : i1 to i32
    %c0_i32_52 = arith.constant 0 : i32
    %254 = arith.cmpi ne, %253, %c0_i32_52 : i32
    scf.if %254 {
      %c0_53 = arith.constant 0 : index
      %c0_54 = arith.constant 0 : index
      %255 = vector.load %arg7[%c0_53, %c0_54] : memref<8x128xf32, #tpu.memory_space<vmem>>, vector<8x128xf32>
      tpu.vector_store %arg7[%c0_53, %c0_54], %249 {strides = array<i32>} : memref<8x128xf32, #tpu.memory_space<vmem>>, vector<8x128xf32>,
    } else {
    }
    return
  }
  func.func @transform_0(%arg0: i32, %arg1: i32) -> (i32, i32, i32) {
    %c0_i32 = arith.constant 0 : i32
    %c0_i32_0 = arith.constant 0 : i32
    return %arg1, %arg0, %c0_i32 : i32, i32, i32
  }
  func.func @transform_1(%arg0: i32, %arg1: i32) -> (i32, i32) {
    %c0_i32 = arith.constant 0 : i32
    %c0_i32_0 = arith.constant 0 : i32
    return %arg0, %c0_i32 : i32, i32
  }
  func.func @transform_2(%arg0: i32, %arg1: i32) -> (i32, i32) {
    %c0_i32 = arith.constant 0 : i32
    %c0_i32_0 = arith.constant 0 : i32
    %c0_i32_1 = arith.constant 0 : i32
    return %c0_i32, %c0_i32_0 : i32, i32
  }
  func.func @transform_3(%arg0: i32, %arg1: i32) -> (i32, i32) {
    %c0_i32 = arith.constant 0 : i32
    %c0_i32_0 = arith.constant 0 : i32
    %c0_i32_1 = arith.constant 0 : i32
    return %c0_i32, %c0_i32_0 : i32, i32
  }
  func.func @transform_4(%arg0: i32, %arg1: i32) -> (i32, i32) {
    %c0_i32 = arith.constant 0 : i32
    %c0_i32_0 = arith.constant 0 : i32
    %c0_i32_1 = arith.constant 0 : i32
    return %c0_i32, %c0_i32_0 : i32, i32
  }
  func.func @transform_5(%arg0: i32, %arg1: i32) -> (i32, i32) {
    %c0_i32 = arith.constant 0 : i32
    %c0_i32_0 = arith.constant 0 : i32
    return %arg0, %c0_i32 : i32, i32
  }
}

</mosaic_0001>

<bundles_post_ra>
// kernel: image_captioning_forward.3
= control target key start
LH: loop header
LB: loop body
LE: loop exit
PB: predicated region body
PF: predicated region fallthrough
CT: control target
= control target key end

     0   :  { %v316_v3 = vmov 0.0   ;;  %s547_s1 = inlined_call_operand.vmem [shape: f32[128,512], index: 1, kind: input, shape index: {}]   ;;  %s548_s0 = inlined_call_operand.vmem [shape: f32[8,128], index: 0, kind: input, shape index: {}]   ;;  %s549_s2 = inlined_call_operand.vmem [shape: f32[1,512], index: 2, kind: input, shape index: {}]   ;;  %s550_s3 = inlined_call_operand.vmem [shape: f32[8,512], index: 3, kind: output, shape index: {}]  }
   0x1   :  { %v16_v0 = vld [vmem:[%s547_s1 + $0x8] sm:$0xff]  ;;  %v18_v2 = vld [vmem:[%s547_s1 + $0x18] sm:$0xff]  ;;  %165 = vmatprep.mubr.f32.mxu0 %v316_v3  ;;  %236 = vmatprep.mubr.f32.mxu1 %v316_v3  ;;  %v15_v6 = vld [vmem:[%s547_s1] sm:$0xff] }
   0x2   :  { %v20_v1 = vld [vmem:[%s547_s1 + $0x28] sm:$0xff]  ;;  %v22_v5 = vld [vmem:[%s547_s1 + $0x38] sm:$0xff]  ;;  %v19_v7 = vld [vmem:[%s547_s1 + $0x20] sm:$0xff] }
   0x3   :  { %v251_v4 = vpack.c.bf16 %v20_v1, %v16_v0  ;;  %v283_v8 = vpack.c.bf16 %v22_v5, %v18_v2  ;;  %v253_v9 = vpack.c.bf16 %v19_v7, %v15_v6  ;;  %v17_v10 = vld [vmem:[%s547_s1 + $0x10] sm:$0xff]  ;;  %v24_v12 = vld [vmem:[%s547_s1 + $0x48] sm:$0xff]  ;;  %v26_v15 = vld [vmem:[%s547_s1 + $0x58] sm:$0xff] }
   0x4   :  { %v21_v11 = vld [vmem:[%s547_s1 + $0x30] sm:$0xff]  ;;  %v28_v14 = vld [vmem:[%s547_s1 + $0x68] sm:$0xff]  ;;  %v30_v16 = vld [vmem:[%s547_s1 + $0x78] sm:$0xff] }
   0x5   :  { %252 = vmatprep.subr.bf16.mxu0 %v251_v4  ;;  %v285_v13 = vpack.c.bf16 %v21_v11, %v17_v10  ;;  %284 = vmatprep.subr.bf16.mxu1 %v283_v8  ;;  %v255_v17 = vpack.c.bf16 %v28_v14, %v24_v12  ;;  %v287_v18 = vpack.c.bf16 %v30_v16, %v26_v15  ;;  %v23_v19 = vld [vmem:[%s547_s1 + $0x40] sm:$0xff]  ;;  %v25_v21 = vld [vmem:[%s547_s1 + $0x50] sm:$0xff]  ;;  %v32_v24 = vld [vmem:[%s547_s1 + $0x88] sm:$0xff] }
   0x6   :  { %254 = vmatpush1.bf16.msra.mxu0 %v253_v9  ;;  %v27_v20 = vld [vmem:[%s547_s1 + $0x60] sm:$0xff]  ;;  %v29_v23 = vld [vmem:[%s547_s1 + $0x70] sm:$0xff]  ;;  %v36_v25 = vld [vmem:[%s547_s1 + $0xa8] sm:$0xff] }
   0x7   :  { %286 = vmatpush1.bf16.msra.mxu1 %v285_v13  ;;  %v257_v22 = vpack.c.bf16 %v27_v20, %v23_v19  ;;  %256 = vmatprep.subr.bf16.mxu0 %v255_v17  ;;  %v289_v26 = vpack.c.bf16 %v29_v23, %v25_v21  ;;  %v259_v27 = vpack.c.bf16 %v36_v25, %v32_v24  ;;  %v34_v28 = vld [vmem:[%s547_s1 + $0x98] sm:$0xff]  ;;  %v31_v30 = vld [vmem:[%s547_s1 + $0x80] sm:$0xff]  ;;  %v33_v33 = vld [vmem:[%s547_s1 + $0x90] sm:$0xff] }
   0x8   :  { %288 = vmatprep.subr.bf16.mxu1 %v287_v18  ;;  %v38_v29 = vld [vmem:[%s547_s1 + $0xb8] sm:$0xff]  ;;  %v35_v32 = vld [vmem:[%s547_s1 + $0xa0] sm:$0xff]  ;;  %v37_v34 = vld [vmem:[%s547_s1 + $0xb0] sm:$0xff] }
   0x9   :  { %v291_v31 = vpack.c.bf16 %v38_v29, %v34_v28  ;;  %v261_v35 = vpack.c.bf16 %v35_v32, %v31_v30  ;;  %v40_v36 = vld [vmem:[%s547_s1 + $0xc8] sm:$0xff]  ;;  %v42_v38 = vld [vmem:[%s547_s1 + $0xd8] sm:$0xff]  ;;  %v293_v39 = vpack.c.bf16 %v37_v34, %v33_v33  ;;  %v39_v42 = vld [vmem:[%s547_s1 + $0xc0] sm:$0xff]  ;;  %v81_v34 = vlaneseq }
   0xa   :  { %258 = vmatpush1.bf16.msra.mxu0 %v257_v22  ;;  %v44_v37 = vld [vmem:[%s547_s1 + $0xe8] sm:$0xff]  ;;  %v46_v41 = vld [vmem:[%s547_s1 + $0xf8] sm:$0xff]  ;;  %v43_v43 = vld [vmem:[%s547_s1 + $0xe0] sm:$0xff] }
   0xb   :  { %290 = vmatpush1.bf16.msra.mxu1 %v289_v26  ;;  %260 = vmatprep.subr.bf16.mxu0 %v259_v27  ;;  %v263_v40 = vpack.c.bf16 %v44_v37, %v40_v36  ;;  %v295_v44 = vpack.c.bf16 %v46_v41, %v42_v38  ;;  %v41_v45 = vld [vmem:[%s547_s1 + $0xd0] sm:$0xff]  ;;  %v48_v47 = vld [vmem:[%s547_s1 + $0x108] sm:$0xff]  ;;  %v50_v49 = vld [vmem:[%s547_s1 + $0x118] sm:$0xff]  ;;  %v265_v51 = vpack.c.bf16 %v43_v43, %v39_v42 }
   0xc   :  { %292 = vmatprep.subr.bf16.mxu1 %v291_v31  ;;  %v45_v46 = vld [vmem:[%s547_s1 + $0xf0] sm:$0xff]  ;;  %v52_v48 = vld [vmem:[%s547_s1 + $0x128] sm:$0xff]  ;;  %v54_v50 = vld [vmem:[%s547_s1 + $0x138] sm:$0xff] }
   0xd   :  { %v297_v52 = vpack.c.bf16 %v45_v46, %v41_v45  ;;  %v267_v53 = vpack.c.bf16 %v52_v48, %v48_v47  ;;  %v47_v54 = vld [vmem:[%s547_s1 + $0x100] sm:$0xff]  ;;  %v49_v56 = vld [vmem:[%s547_s1 + $0x110] sm:$0xff]  ;;  %v299_v57 = vpack.c.bf16 %v54_v50, %v50_v49  ;;  %v56_v59 = vld [vmem:[%s547_s1 + $0x148] sm:$0xff] }
   0xe   :  { %262 = vmatpush1.bf16.msra.mxu0 %v261_v35  ;;  %v51_v55 = vld [vmem:[%s547_s1 + $0x120] sm:$0xff]  ;;  %v53_v58 = vld [vmem:[%s547_s1 + $0x130] sm:$0xff]  ;;  %v60_v60 = vld [vmem:[%s547_s1 + $0x168] sm:$0xff]  ;;  %v82_v35 = vshrl.u32 %v81_v34, 7 }
   0xf   :  { %294 = vmatpush1.bf16.msra.mxu1 %v293_v39  ;;  %264 = vmatprep.subr.bf16.mxu0 %v263_v40  ;;  %v58_v61 = vld [vmem:[%s547_s1 + $0x158] sm:$0xff]  ;;  %v269_v63 = vpack.c.bf16 %v51_v55, %v47_v54  ;;  %v301_v0 = vpack.c.bf16 %v53_v58, %v49_v56  ;;  %v271_v1 = vpack.c.bf16 %v60_v60, %v56_v59  ;;  %v55_v2 = vld [vmem:[%s547_s1 + $0x140] sm:$0xff]  ;;  %v57_v4 = vld [vmem:[%s547_s1 + $0x150] sm:$0xff] }
  0x10   :  { %296 = vmatprep.subr.bf16.mxu1 %v295_v44  ;;  %v62_v62 = vld [vmem:[%s547_s1 + $0x178] sm:$0xff]  ;;  %v59_v3 = vld [vmem:[%s547_s1 + $0x160] sm:$0xff]  ;;  %v61_v6 = vld [vmem:[%s547_s1 + $0x170] sm:$0xff]  ;;  %v83_v36 = vsub.s32 0, %v82_v35  ;;  %v91_v38 = vsub.s32 2, %v82_v35  ;;  %v87_v39 = vsub.s32 1, %v82_v35 }
  0x11   :  { %v303_v5 = vpack.c.bf16 %v62_v62, %v58_v61  ;;  %v64_v7 = vld [vmem:[%s547_s1 + $0x188] sm:$0xff]  ;;  %v66_v9 = vld [vmem:[%s547_s1 + $0x198] sm:$0xff]  ;;  %v273_v11 = vpack.c.bf16 %v59_v3, %v55_v2  ;;  %v305_v12 = vpack.c.bf16 %v61_v6, %v57_v4  ;;  %v63_v14 = vld [vmem:[%s547_s1 + $0x180] sm:$0xff]  ;;  %v95_v40 = vsub.s32 3, %v82_v35 }
  0x12   :  { %266 = vmatpush1.bf16.msra.mxu0 %v265_v51  ;;  %v68_v8 = vld [vmem:[%s547_s1 + $0x1a8] sm:$0xff]  ;;  %v70_v10 = vld [vmem:[%s547_s1 + $0x1b8] sm:$0xff]  ;;  %v67_v15 = vld [vmem:[%s547_s1 + $0x1a0] sm:$0xff] }
  0x13   :  { %298 = vmatpush1.bf16.msra.mxu1 %v297_v52  ;;  %268 = vmatprep.subr.bf16.mxu0 %v267_v53  ;;  %v275_v13 = vpack.c.bf16 %v68_v8, %v64_v7  ;;  %v65_v16 = vld [vmem:[%s547_s1 + $0x190] sm:$0xff]  ;;  %v307_v17 = vpack.c.bf16 %v70_v10, %v66_v9  ;;  %v72_v19 = vld [vmem:[%s547_s1 + $0x1c8] sm:$0xff]  ;;  %v74_v21 = vld [vmem:[%s547_s1 + $0x1d8] sm:$0xff]  ;;  %v277_v23 = vpack.c.bf16 %v67_v15, %v63_v14 }
  0x14   :  { %300 = vmatprep.subr.bf16.mxu1 %v299_v57  ;;  %v69_v18 = vld [vmem:[%s547_s1 + $0x1b0] sm:$0xff]  ;;  %v76_v20 = vld [vmem:[%s547_s1 + $0x1e8] sm:$0xff]  ;;  %v78_v22 = vld [vmem:[%s547_s1 + $0x1f8] sm:$0xff] }
  0x15   :  { %v309_v24 = vpack.c.bf16 %v69_v18, %v65_v16  ;;  %v279_v25 = vpack.c.bf16 %v76_v20, %v72_v19  ;;  %v71_v26 = vld [vmem:[%s547_s1 + $0x1c0] sm:$0xff]  ;;  %v311_v28 = vpack.c.bf16 %v78_v22, %v74_v21  ;;  %v73_v29 = vld [vmem:[%s547_s1 + $0x1d0] sm:$0xff] }
  0x16   :  { %270 = vmatpush1.bf16.msra.mxu0 %v269_v63  ;;  %v75_v27 = vld [vmem:[%s547_s1 + $0x1e0] sm:$0xff]  ;;  %v77_v30 = vld [vmem:[%s547_s1 + $0x1f0] sm:$0xff] }
  0x17   :  { %302 = vmatpush1.bf16.msra.mxu1 %v301_v0  ;;  %272 = vmatprep.subr.bf16.mxu0 %v271_v1  ;;  %v281_v31 = vpack.c.bf16 %v75_v27, %v71_v26  ;;  %v313_v32 = vpack.c.bf16 %v77_v30, %v73_v29  ;;  %v14_v33 = vld [vmem:[%s548_s0] sm:$0xff] }
  0x18   :  { %304 = vmatprep.subr.bf16.mxu1 %v303_v5  ;;  %v79_v37 = vld [vmem:[%s549_s2] sm:$0xf] }
  0x19   :  { %v84_v41 = vrot.slane %v79_v37, %v83_v36  ;;  %v92_v42 = vrot.slane %v79_v37, %v91_v38  ;;  %v88_v43 = vrot.slane %v79_v37, %v87_v39  ;;  %v96_v44 = vrot.slane %v79_v37, %v95_v40 }
  0x1a   :  { %274 = vmatpush1.bf16.msra.mxu0 %v273_v11 }
  0x1b   :  { %306 = vmatpush1.bf16.msra.mxu1 %v305_v12  ;;  %276 = vmatprep.subr.bf16.mxu0 %v275_v13 }
  0x1c   :  { %308 = vmatprep.subr.bf16.mxu1 %v307_v17 }
  0x1e   :  { %278 = vmatpush1.bf16.msra.mxu0 %v277_v23 }
  0x1f   :  { %310 = vmatpush1.bf16.msra.mxu1 %v309_v24  ;;  %280 = vmatprep.subr.bf16.mxu0 %v279_v25 }
  0x20   :  { %312 = vmatprep.subr.bf16.mxu1 %v311_v28 }
  0x22   :  { %282 = vmatpush1.bf16.msra.mxu0 %v281_v31 }
  0x23   :  { %314 = vmatpush1.bf16.msra.mxu1 %v313_v32 }
  0x25   :  { %166 = vmatmul.mubr.f32.vlgmr.msra.gmra.mrb[0].mxu0 %v14_v33 }
  0x26   :  { %237 = vmatmul.mubr.f32.vlgmr.msra.gmra.mrb[0].mxu1 %v14_v33 }
  0xf8   :  { %v167_v45 = vpop.f32.mrb[0].mxu0 }
  0xf9   :  { %v168_v46 = vadd.f32 %v167_v45, %v84_v41  ;;  %v238_v47 = vpop.f32.mrb[0].mxu1  ;;  %v169_v48 = vpop.f32.mrb[1].mxu0 }
  0xfa   :  { %v239_v49 = vadd.f32 %v238_v47, %v92_v42  ;;  %v170_v50 = vadd.f32 %v169_v48, %v88_v43  ;;  %v240_v51 = vpop.f32.mrb[1].mxu1 }
  0xfb   :  { %243 = vst [vmem:[%s550_s3] sm:$0xff] %v168_v46  ;;  %v241_v52 = vadd.f32 %v240_v51, %v96_v44 }
  0xfc   :  { %245 = vst [vmem:[%s550_s3 + $0x10] sm:$0xff] %v239_v49  ;;  %244 = vst [vmem:[%s550_s3 + $0x8] sm:$0xff] %v170_v50 }
  0xfd   :  { %246 = vst [vmem:[%s550_s3 + $0x18] sm:$0xff] %v241_v52 }

// kernel: image_captioning_forward.2
= control target key start
LH: loop header
LB: loop body
LE: loop exit
PB: predicated region body
PF: predicated region fallthrough
CT: control target
= control target key end

     0   :  { %v2584_v3 = vmov 0.0   ;;  %s3460_s2 = inlined_call_operand.vmem [shape: f32[128,512], index: 2, kind: input, shape index: {}]   ;;  %s3461_s3 = inlined_call_operand.vmem [shape: f32[128,512], index: 3, kind: input, shape index: {}]   ;;  %s3462_s0 = inlined_call_operand.vmem [shape: f32[8,8,128], index: 0, kind: input, shape index: {}]   ;;  %s3463_s1 = inlined_call_operand.vmem [shape: f32[8,128], index: 1, kind: input, shape index: {}]   ;;  %s3464_s4 = inlined_call_operand.vmem [shape: f32[1,512], index: 4, kind: input, shape index: {}]   ;;  %s3465_s5 = inlined_call_operand.vmem [shape: f32[8,128], index: 5, kind: output, shape index: {}]  }
   0x1   :  { %v44_v0 = vld [vmem:[%s3460_s2 + $0x8] sm:$0xff]  ;;  %v46_v2 = vld [vmem:[%s3460_s2 + $0x18] sm:$0xff]  ;;  %193 = vmatprep.mubr.f32.mxu0 %v2584_v3  ;;  %306 = vmatprep.mubr.f32.mxu1 %v2584_v3  ;;  %v43_v6 = vld [vmem:[%s3460_s2] sm:$0xff] }
   0x2   :  { %v48_v1 = vld [vmem:[%s3460_s2 + $0x28] sm:$0xff]  ;;  %v50_v5 = vld [vmem:[%s3460_s2 + $0x38] sm:$0xff]  ;;  %v47_v7 = vld [vmem:[%s3460_s2 + $0x20] sm:$0xff] }
   0x3   :  { %v1815_v4 = vpack.c.bf16 %v48_v1, %v44_v0  ;;  %v1847_v8 = vpack.c.bf16 %v50_v5, %v46_v2  ;;  %v1817_v9 = vpack.c.bf16 %v47_v7, %v43_v6  ;;  %v45_v10 = vld [vmem:[%s3460_s2 + $0x10] sm:$0xff]  ;;  %v52_v12 = vld [vmem:[%s3460_s2 + $0x48] sm:$0xff]  ;;  %v54_v15 = vld [vmem:[%s3460_s2 + $0x58] sm:$0xff] }
   0x4   :  { %v49_v11 = vld [vmem:[%s3460_s2 + $0x30] sm:$0xff]  ;;  %v56_v14 = vld [vmem:[%s3460_s2 + $0x68] sm:$0xff]  ;;  %v58_v16 = vld [vmem:[%s3460_s2 + $0x78] sm:$0xff] }
   0x5   :  { %1816 = vmatprep.subr.bf16.mxu0 %v1815_v4  ;;  %v1849_v13 = vpack.c.bf16 %v49_v11, %v45_v10  ;;  %1848 = vmatprep.subr.bf16.mxu1 %v1847_v8  ;;  %v1819_v17 = vpack.c.bf16 %v56_v14, %v52_v12  ;;  %v1851_v18 = vpack.c.bf16 %v58_v16, %v54_v15  ;;  %v51_v19 = vld [vmem:[%s3460_s2 + $0x40] sm:$0xff]  ;;  %v53_v21 = vld [vmem:[%s3460_s2 + $0x50] sm:$0xff]  ;;  %v60_v24 = vld [vmem:[%s3460_s2 + $0x88] sm:$0xff] }
   0x6   :  { %1818 = vmatpush1.bf16.msra.mxu0 %v1817_v9  ;;  %v55_v20 = vld [vmem:[%s3460_s2 + $0x60] sm:$0xff]  ;;  %v57_v23 = vld [vmem:[%s3460_s2 + $0x70] sm:$0xff]  ;;  %v64_v25 = vld [vmem:[%s3460_s2 + $0xa8] sm:$0xff] }
   0x7   :  { %1850 = vmatpush1.bf16.msra.mxu1 %v1849_v13  ;;  %v1821_v22 = vpack.c.bf16 %v55_v20, %v51_v19  ;;  %1820 = vmatprep.subr.bf16.mxu0 %v1819_v17  ;;  %v1853_v26 = vpack.c.bf16 %v57_v23, %v53_v21  ;;  %v1823_v27 = vpack.c.bf16 %v64_v25, %v60_v24  ;;  %v62_v28 = vld [vmem:[%s3460_s2 + $0x98] sm:$0xff]  ;;  %v59_v30 = vld [vmem:[%s3460_s2 + $0x80] sm:$0xff]  ;;  %v61_v33 = vld [vmem:[%s3460_s2 + $0x90] sm:$0xff] }
   0x8   :  { %1852 = vmatprep.subr.bf16.mxu1 %v1851_v18  ;;  %v66_v29 = vld [vmem:[%s3460_s2 + $0xb8] sm:$0xff]  ;;  %v63_v32 = vld [vmem:[%s3460_s2 + $0xa0] sm:$0xff]  ;;  %v65_v34 = vld [vmem:[%s3460_s2 + $0xb0] sm:$0xff] }
   0x9   :  { %v1855_v31 = vpack.c.bf16 %v66_v29, %v62_v28  ;;  %v1825_v35 = vpack.c.bf16 %v63_v32, %v59_v30  ;;  %v68_v36 = vld [vmem:[%s3460_s2 + $0xc8] sm:$0xff]  ;;  %v70_v38 = vld [vmem:[%s3460_s2 + $0xd8] sm:$0xff]  ;;  %v1857_v39 = vpack.c.bf16 %v65_v34, %v61_v33  ;;  %v67_v42 = vld [vmem:[%s3460_s2 + $0xc0] sm:$0xff] }
   0xa   :  { %1822 = vmatpush1.bf16.msra.mxu0 %v1821_v22  ;;  %v72_v37 = vld [vmem:[%s3460_s2 + $0xe8] sm:$0xff]  ;;  %v74_v41 = vld [vmem:[%s3460_s2 + $0xf8] sm:$0xff]  ;;  %v71_v43 = vld [vmem:[%s3460_s2 + $0xe0] sm:$0xff] }
   0xb   :  { %1854 = vmatpush1.bf16.msra.mxu1 %v1853_v26  ;;  %1824 = vmatprep.subr.bf16.mxu0 %v1823_v27  ;;  %v1827_v40 = vpack.c.bf16 %v72_v37, %v68_v36  ;;  %v1859_v44 = vpack.c.bf16 %v74_v41, %v70_v38  ;;  %v69_v45 = vld [vmem:[%s3460_s2 + $0xd0] sm:$0xff]  ;;  %v76_v47 = vld [vmem:[%s3460_s2 + $0x108] sm:$0xff]  ;;  %v78_v49 = vld [vmem:[%s3460_s2 + $0x118] sm:$0xff]  ;;  %v1829_v51 = vpack.c.bf16 %v71_v43, %v67_v42 }
   0xc   :  { %1856 = vmatprep.subr.bf16.mxu1 %v1855_v31  ;;  %v73_v46 = vld [vmem:[%s3460_s2 + $0xf0] sm:$0xff]  ;;  %v80_v48 = vld [vmem:[%s3460_s2 + $0x128] sm:$0xff]  ;;  %v82_v50 = vld [vmem:[%s3460_s2 + $0x138] sm:$0xff] }
   0xd   :  { %v1861_v52 = vpack.c.bf16 %v73_v46, %v69_v45  ;;  %v1831_v53 = vpack.c.bf16 %v80_v48, %v76_v47  ;;  %v75_v54 = vld [vmem:[%s3460_s2 + $0x100] sm:$0xff]  ;;  %v77_v56 = vld [vmem:[%s3460_s2 + $0x110] sm:$0xff]  ;;  %v1863_v57 = vpack.c.bf16 %v82_v50, %v78_v49  ;;  %v84_v59 = vld [vmem:[%s3460_s2 + $0x148] sm:$0xff] }
   0xe   :  { %1826 = vmatpush1.bf16.msra.mxu0 %v1825_v35  ;;  %v79_v55 = vld [vmem:[%s3460_s2 + $0x120] sm:$0xff]  ;;  %v81_v58 = vld [vmem:[%s3460_s2 + $0x130] sm:$0xff]  ;;  %v88_v60 = vld [vmem:[%s3460_s2 + $0x168] sm:$0xff] }
   0xf   :  { %1858 = vmatpush1.bf16.msra.mxu1 %v1857_v39  ;;  %1828 = vmatprep.subr.bf16.mxu0 %v1827_v40  ;;  %v86_v61 = vld [vmem:[%s3460_s2 + $0x158] sm:$0xff]  ;;  %v1833_v63 = vpack.c.bf16 %v79_v55, %v75_v54  ;;  %v1865_v0 = vpack.c.bf16 %v81_v58, %v77_v56  ;;  %v1835_v1 = vpack.c.bf16 %v88_v60, %v84_v59  ;;  %v83_v2 = vld [vmem:[%s3460_s2 + $0x140] sm:$0xff]  ;;  %v85_v5 = vld [vmem:[%s3460_s2 + $0x150] sm:$0xff] }
  0x10   :  { %1860 = vmatprep.subr.bf16.mxu1 %v1859_v44  ;;  %v90_v62 = vld [vmem:[%s3460_s2 + $0x178] sm:$0xff]  ;;  %v87_v4 = vld [vmem:[%s3460_s2 + $0x160] sm:$0xff]  ;;  %v89_v7 = vld [vmem:[%s3460_s2 + $0x170] sm:$0xff] }
  0x11   :  { %v1867_v6 = vpack.c.bf16 %v90_v62, %v86_v61  ;;  %v92_v8 = vld [vmem:[%s3460_s2 + $0x188] sm:$0xff]  ;;  %v94_v10 = vld [vmem:[%s3460_s2 + $0x198] sm:$0xff]  ;;  %v1837_v12 = vpack.c.bf16 %v87_v4, %v83_v2  ;;  %v1869_v13 = vpack.c.bf16 %v89_v7, %v85_v5  ;;  %v91_v15 = vld [vmem:[%s3460_s2 + $0x180] sm:$0xff] }
  0x12   :  { %1830 = vmatpush1.bf16.msra.mxu0 %v1829_v51  ;;  %v96_v9 = vld [vmem:[%s3460_s2 + $0x1a8] sm:$0xff]  ;;  %v98_v11 = vld [vmem:[%s3460_s2 + $0x1b8] sm:$0xff]  ;;  %v95_v16 = vld [vmem:[%s3460_s2 + $0x1a0] sm:$0xff] }
  0x13   :  { %1862 = vmatpush1.bf16.msra.mxu1 %v1861_v52  ;;  %1832 = vmatprep.subr.bf16.mxu0 %v1831_v53  ;;  %v1839_v14 = vpack.c.bf16 %v96_v9, %v92_v8  ;;  %v93_v17 = vld [vmem:[%s3460_s2 + $0x190] sm:$0xff]  ;;  %v1871_v18 = vpack.c.bf16 %v98_v11, %v94_v10  ;;  %v100_v20 = vld [vmem:[%s3460_s2 + $0x1c8] sm:$0xff]  ;;  %v102_v22 = vld [vmem:[%s3460_s2 + $0x1d8] sm:$0xff]  ;;  %v1841_v24 = vpack.c.bf16 %v95_v16, %v91_v15 }
  0x14   :  { %1864 = vmatprep.subr.bf16.mxu1 %v1863_v57  ;;  %v97_v19 = vld [vmem:[%s3460_s2 + $0x1b0] sm:$0xff]  ;;  %v104_v21 = vld [vmem:[%s3460_s2 + $0x1e8] sm:$0xff]  ;;  %v106_v23 = vld [vmem:[%s3460_s2 + $0x1f8] sm:$0xff] }
  0x15   :  { %v1873_v25 = vpack.c.bf16 %v97_v19, %v93_v17  ;;  %v1843_v26 = vpack.c.bf16 %v104_v21, %v100_v20  ;;  %v99_v27 = vld [vmem:[%s3460_s2 + $0x1c0] sm:$0xff]  ;;  %v101_v29 = vld [vmem:[%s3460_s2 + $0x1d0] sm:$0xff]  ;;  %v1875_v30 = vpack.c.bf16 %v106_v23, %v102_v22  ;;  %v356_v32 = vld [vmem:[%s3461_s3 + $0x8] sm:$0xff] }
  0x16   :  { %1834 = vmatpush1.bf16.msra.mxu0 %v1833_v63  ;;  %v103_v28 = vld [vmem:[%s3460_s2 + $0x1e0] sm:$0xff]  ;;  %v105_v31 = vld [vmem:[%s3460_s2 + $0x1f0] sm:$0xff]  ;;  %v360_v33 = vld [vmem:[%s3461_s3 + $0x28] sm:$0xff] }
  0x17   :  { %1866 = vmatpush1.bf16.msra.mxu1 %v1865_v0  ;;  %1836 = vmatprep.subr.bf16.mxu0 %v1835_v1  ;;  %v358_v34 = vld [vmem:[%s3461_s3 + $0x18] sm:$0xff]  ;;  %v1845_v36 = vpack.c.bf16 %v103_v28, %v99_v27  ;;  %v26_v37 = vld [vmem:[%s3462_s0] sm:$0xff]  ;;  %v1877_v39 = vpack.c.bf16 %v105_v31, %v101_v29  ;;  %v2829_v40 = vpack.c.bf16 %v360_v33, %v356_v32  ;;  %v357_v44 = vld [vmem:[%s3461_s3 + $0x10] sm:$0xff] }
  0x18   :  { %1868 = vmatprep.subr.bf16.mxu1 %v1867_v6  ;;  %v362_v35 = vld [vmem:[%s3461_s3 + $0x38] sm:$0xff]  ;;  %v2827_v38 = vld [vmem:[%s3463_s1] sm:$0xff]  ;;  %v361_v45 = vld [vmem:[%s3461_s3 + $0x30] sm:$0xff] }
  0x19   :  { %v355_v41 = vld [vmem:[%s3461_s3] sm:$0xff]  ;;  %v2837_v43 = vpack.c.bf16 %v362_v35, %v358_v34  ;;  %v35_v46 = vadd.f32 %v2827_v38, %v26_v37  ;;  %v364_v47 = vld [vmem:[%s3461_s3 + $0x48] sm:$0xff]  ;;  %v366_v51 = vld [vmem:[%s3461_s3 + $0x58] sm:$0xff]  ;;  %v2864_v53 = vpack.c.bf16 %v361_v45, %v357_v44 }
  0x1a   :  { %1838 = vmatpush1.bf16.msra.mxu0 %v1837_v12  ;;  %v359_v42 = vld [vmem:[%s3461_s3 + $0x20] sm:$0xff]  ;;  %v368_v48 = vld [vmem:[%s3461_s3 + $0x68] sm:$0xff]  ;;  %v370_v52 = vld [vmem:[%s3461_s3 + $0x78] sm:$0xff] }
  0x1b   :  { %1870 = vmatpush1.bf16.msra.mxu1 %v1869_v13  ;;  %1840 = vmatprep.subr.bf16.mxu0 %v1839_v14  ;;  %v2852_v49 = vpack.c.bf16 %v359_v42, %v355_v41  ;;  %v27_v50 = vld [vmem:[%s3462_s0 + $0x8] sm:$0xff]  ;;  %v363_v54 = vld [vmem:[%s3461_s3 + $0x40] sm:$0xff]  ;;  %v2873_v56 = vpack.c.bf16 %v368_v48, %v364_v47  ;;  %v365_v57 = vld [vmem:[%s3461_s3 + $0x50] sm:$0xff]  ;;  %v2882_v60 = vpack.c.bf16 %v370_v52, %v366_v51 }
  0x1c   :  { %1872 = vmatprep.subr.bf16.mxu1 %v1871_v18  ;;  %v367_v55 = vld [vmem:[%s3461_s3 + $0x60] sm:$0xff]  ;;  %v369_v58 = vld [vmem:[%s3461_s3 + $0x70] sm:$0xff]  ;;  %v36_v59 = vadd.f32 %v2827_v38, %v27_v50  ;;  %v372_v61 = vld [vmem:[%s3461_s3 + $0x88] sm:$0xff] }
  0x1d   :  { %v376_v62 = vld [vmem:[%s3461_s3 + $0xa8] sm:$0xff]  ;;  %v2891_v63 = vpack.c.bf16 %v367_v55, %v363_v54  ;;  %v28_v0 = vld [vmem:[%s3462_s0 + $0x10] sm:$0xff]  ;;  %v374_v1 = vld [vmem:[%s3461_s3 + $0x98] sm:$0xff]  ;;  %v2904_v4 = vpack.c.bf16 %v369_v58, %v365_v57 }
  0x1e   :  { %1842 = vmatpush1.bf16.msra.mxu0 %v1841_v24  ;;  %v378_v2 = vld [vmem:[%s3461_s3 + $0xb8] sm:$0xff]  ;;  %v371_v5 = vld [vmem:[%s3461_s3 + $0x80] sm:$0xff]  ;;  %v2914_v7 = vpack.c.bf16 %v376_v62, %v372_v61  ;;  %v373_v8 = vld [vmem:[%s3461_s3 + $0x90] sm:$0xff]  ;;  %v37_v10 = vadd.f32 %v2827_v38, %v28_v0 }
  0x1f   :  { %1874 = vmatpush1.bf16.msra.mxu1 %v1873_v25  ;;  %1844 = vmatprep.subr.bf16.mxu0 %v1843_v26  ;;  %v375_v6 = vld [vmem:[%s3461_s3 + $0xa0] sm:$0xff]  ;;  %v377_v9 = vld [vmem:[%s3461_s3 + $0xb0] sm:$0xff]  ;;  %v2924_v11 = vpack.c.bf16 %v378_v2, %v374_v1  ;;  %v380_v12 = vld [vmem:[%s3461_s3 + $0xc8] sm:$0xff] }
  0x20   :  { %1876 = vmatprep.subr.bf16.mxu1 %v1875_v30  ;;  %v384_v13 = vld [vmem:[%s3461_s3 + $0xe8] sm:$0xff]  ;;  %v2933_v14 = vpack.c.bf16 %v375_v6, %v371_v5  ;;  %v29_v15 = vld [vmem:[%s3462_s0 + $0x18] sm:$0xff]  ;;  %v2946_v18 = vpack.c.bf16 %v377_v9, %v373_v8  ;;  %v379_v19 = vld [vmem:[%s3461_s3 + $0xc0] sm:$0xff] }
  0x21   :  { %v382_v16 = vld [vmem:[%s3461_s3 + $0xd8] sm:$0xff]  ;;  %v383_v20 = vld [vmem:[%s3461_s3 + $0xe0] sm:$0xff]  ;;  %v2956_v21 = vpack.c.bf16 %v384_v13, %v380_v12  ;;  %v381_v22 = vld [vmem:[%s3461_s3 + $0xd0] sm:$0xff]  ;;  %v38_v24 = vadd.f32 %v2827_v38, %v29_v15 }
  0x22   :  { %1846 = vmatpush1.bf16.msra.mxu0 %v1845_v36  ;;  %v386_v17 = vld [vmem:[%s3461_s3 + $0xf8] sm:$0xff]  ;;  %v385_v23 = vld [vmem:[%s3461_s3 + $0xf0] sm:$0xff]  ;;  %v388_v26 = vld [vmem:[%s3461_s3 + $0x108] sm:$0xff]  ;;  %v2975_v28 = vpack.c.bf16 %v383_v20, %v379_v19 }
  0x23   :  { %1878 = vmatpush1.bf16.msra.mxu1 %v1877_v39  ;;  %1880 = vmatprep.subr.bf16.mxu0 %v2829_v40  ;;  %v2966_v25 = vpack.c.bf16 %v386_v17, %v382_v16  ;;  %v392_v27 = vld [vmem:[%s3461_s3 + $0x128] sm:$0xff]  ;;  %v30_v29 = vld [vmem:[%s3462_s0 + $0x20] sm:$0xff]  ;;  %v390_v30 = vld [vmem:[%s3461_s3 + $0x118] sm:$0xff]  ;;  %v2988_v32 = vpack.c.bf16 %v385_v23, %v381_v22 }
  0x24   :  { %1912 = vmatprep.subr.bf16.mxu1 %v2837_v43  ;;  %v394_v31 = vld [vmem:[%s3461_s3 + $0x138] sm:$0xff]  ;;  %v387_v33 = vld [vmem:[%s3461_s3 + $0x100] sm:$0xff]  ;;  %v2998_v35 = vpack.c.bf16 %v392_v27, %v388_v26  ;;  %v389_v36 = vld [vmem:[%s3461_s3 + $0x110] sm:$0xff]  ;;  %v39_v39 = vadd.f32 %v2827_v38, %v30_v29 }
  0x25   :  { %194 = vmatmul.mubr.f32.vlgmr.msra.gmra.mrb[0].mxu0 %v35_v46  ;;  %v391_v34 = vld [vmem:[%s3461_s3 + $0x120] sm:$0xff]  ;;  %v393_v37 = vld [vmem:[%s3461_s3 + $0x130] sm:$0xff]  ;;  %v3008_v41 = vpack.c.bf16 %v394_v31, %v390_v30  ;;  %v396_v42 = vld [vmem:[%s3461_s3 + $0x148] sm:$0xff] }
  0x26   :  { %307 = vmatmul.mubr.f32.vlgmr.msra.gmra.mrb[0].mxu1 %v35_v46  ;;  %1882 = vmatpush1.bf16.msra.mxu0 %v2852_v49  ;;  %v400_v44 = vld [vmem:[%s3461_s3 + $0x168] sm:$0xff]  ;;  %v3017_v45 = vpack.c.bf16 %v391_v34, %v387_v33  ;;  %v398_v47 = vld [vmem:[%s3461_s3 + $0x158] sm:$0xff]  ;;  %v3030_v50 = vpack.c.bf16 %v393_v37, %v389_v36  ;;  %v395_v51 = vld [vmem:[%s3461_s3 + $0x140] sm:$0xff] }
  0x27   :  { %1914 = vmatpush1.bf16.msra.mxu1 %v2864_v53  ;;  %199 = vmatprep.mubr.f32.mxu0 %v2584_v3  ;;  %v31_v46 = vld [vmem:[%s3462_s0 + $0x28] sm:$0xff]  ;;  %v402_v48 = vld [vmem:[%s3461_s3 + $0x178] sm:$0xff]  ;;  %v399_v52 = vld [vmem:[%s3461_s3 + $0x160] sm:$0xff]  ;;  %v3040_v54 = vpack.c.bf16 %v400_v44, %v396_v42 }
  0x28   :  { %312 = vmatprep.mubr.f32.mxu1 %v2584_v3  ;;  %1884 = vmatprep.subr.bf16.mxu0 %v2873_v56  ;;  %v397_v55 = vld [vmem:[%s3461_s3 + $0x150] sm:$0xff]  ;;  %v40_v58 = vadd.f32 %v2827_v38, %v31_v46  ;;  %v404_v61 = vld [vmem:[%s3461_s3 + $0x188] sm:$0xff]  ;;  %v3059_v0 = vpack.c.bf16 %v399_v52, %v395_v51  ;;  %v406_v2 = vld [vmem:[%s3461_s3 + $0x198] sm:$0xff] }
  0x29   :  { %200 = vmatmul.mubr.f32.gmra.mrb[2].mxu0 %v36_v59  ;;  %1916 = vmatprep.subr.bf16.mxu1 %v2882_v60  ;;  %v401_v57 = vld [vmem:[%s3461_s3 + $0x170] sm:$0xff]  ;;  %v408_v62 = vld [vmem:[%s3461_s3 + $0x1a8] sm:$0xff]  ;;  %v410_v5 = vld [vmem:[%s3461_s3 + $0x1b8] sm:$0xff] }
  0x2a   :  { %313 = vmatmul.mubr.f32.gmra.mrb[2].mxu1 %v36_v59  ;;  %1886 = vmatpush1.bf16.msra.mxu0 %v2891_v63  ;;  %v3050_v59 = vpack.c.bf16 %v402_v48, %v398_v47  ;;  %v32_v1 = vld [vmem:[%s3462_s0 + $0x30] sm:$0xff]  ;;  %v3072_v6 = vpack.c.bf16 %v401_v57, %v397_v55  ;;  %v403_v8 = vld [vmem:[%s3461_s3 + $0x180] sm:$0xff]  ;;  %v3092_v16 = vpack.c.bf16 %v410_v5, %v406_v2  ;;  %v412_v17 = vld [vmem:[%s3461_s3 + $0x1c8] sm:$0xff] }
  0x2b   :  { %1918 = vmatpush1.bf16.msra.mxu1 %v2904_v4  ;;  %205 = vmatprep.mubr.f32.mxu0 %v2584_v3  ;;  %v407_v9 = vld [vmem:[%s3461_s3 + $0x1a0] sm:$0xff]  ;;  %v405_v12 = vld [vmem:[%s3461_s3 + $0x190] sm:$0xff]  ;;  %v41_v15 = vadd.f32 %v2827_v38, %v32_v1  ;;  %v416_v19 = vld [vmem:[%s3461_s3 + $0x1e8] sm:$0xff] }
  0x2c   :  { %318 = vmatprep.mubr.f32.mxu1 %v2584_v3  ;;  %1888 = vmatprep.subr.bf16.mxu0 %v2914_v7  ;;  %v409_v13 = vld [vmem:[%s3461_s3 + $0x1b0] sm:$0xff]  ;;  %v3101_v20 = vpack.c.bf16 %v407_v9, %v403_v8  ;;  %v33_v22 = vld [vmem:[%s3462_s0 + $0x38] sm:$0xff]  ;;  %v411_v27 = vld [vmem:[%s3461_s3 + $0x1c0] sm:$0xff]  ;;  %v3124_v30 = vpack.c.bf16 %v416_v19, %v412_v17 }
  0x2d   :  { %206 = vmatmul.mubr.f32.gmra.mrb[4].mxu0 %v37_v10  ;;  %1920 = vmatprep.subr.bf16.mxu1 %v2924_v11  ;;  %v414_v23 = vld [vmem:[%s3461_s3 + $0x1d8] sm:$0xff]  ;;  %v3114_v26 = vpack.c.bf16 %v409_v13, %v405_v12  ;;  %v415_v29 = vld [vmem:[%s3461_s3 + $0x1e0] sm:$0xff]  ;;  %v413_v31 = vld [vmem:[%s3461_s3 + $0x1d0] sm:$0xff]  ;;  %v42_v34 = vadd.f32 %v2827_v38, %v33_v22  ;;  %v109_v38 = vlaneseq }
  0x2e   :  { %319 = vmatmul.mubr.f32.gmra.mrb[4].mxu1 %v37_v10  ;;  %1890 = vmatpush1.bf16.msra.mxu0 %v2933_v14  ;;  %v3082_v10 = vpack.c.bf16 %v408_v62, %v404_v61  ;;  %v417_v33 = vld [vmem:[%s3461_s3 + $0x1f0] sm:$0xff]  ;;  %v3137_v37 = vpack.c.bf16 %v415_v29, %v411_v27  ;;  %v107_v46 = vld [vmem:[%s3464_s4] sm:$0xf] }
  0x2f   :  { %1922 = vmatpush1.bf16.msra.mxu1 %v2946_v18  ;;  %211 = vmatprep.mubr.f32.mxu0 %v2584_v3  ;;  %v110_v42 = vshrl.u32 %v109_v38, 7 }
  0x30   :  { %324 = vmatprep.mubr.f32.mxu1 %v2584_v3  ;;  %1892 = vmatprep.subr.bf16.mxu0 %v2956_v21 }
  0x31   :  { %212 = vmatmul.mubr.f32.gmra.mrb[6].mxu0 %v38_v24  ;;  %1924 = vmatprep.subr.bf16.mxu1 %v2966_v25  ;;  %v111_v44 = vsub.s32 0, %v110_v42  ;;  %v115_v47 = vsub.s32 1, %v110_v42  ;;  %v123_v55 = vsub.s32 3, %v110_v42  ;;  %v119_v9 = vsub.s32 2, %v110_v42 }
  0x32   :  { %325 = vmatmul.mubr.f32.gmra.mrb[6].mxu1 %v38_v24  ;;  %1894 = vmatpush1.bf16.msra.mxu0 %v2975_v28  ;;  %v418_v24 = vld [vmem:[%s3461_s3 + $0x1f8] sm:$0xff] }
  0x33   :  { %1926 = vmatpush1.bf16.msra.mxu1 %v2988_v32  ;;  %217 = vmatprep.mubr.f32.mxu0 %v2584_v3  ;;  %v3134_v36 = vpack.c.bf16 %v418_v24, %v414_v23  ;;  %v3191_v48 = vrot.slane %v107_v46, %v111_v44  ;;  %v3193_v51 = vrot.slane %v107_v46, %v115_v47 }
  0x34   :  { %330 = vmatprep.mubr.f32.mxu1 %v2584_v3  ;;  %1896 = vmatprep.subr.bf16.mxu0 %v2998_v35  ;;  %v3197_v8 = vrot.slane %v107_v46, %v123_v55  ;;  %v3200_v13 = vrot.slane %v107_v46, %v119_v9 }
  0x35   :  { %218 = vmatmul.mubr.f32.gmra.mrb[8].mxu0 %v39_v39  ;;  %1928 = vmatprep.subr.bf16.mxu1 %v3008_v41 }
  0x36   :  { %331 = vmatmul.mubr.f32.gmra.mrb[8].mxu1 %v39_v39  ;;  %1898 = vmatpush1.bf16.msra.mxu0 %v3017_v45  ;;  %v3141_v39 = vpack.c.bf16 %v417_v33, %v413_v31 }
  0x37   :  { %1930 = vmatpush1.bf16.msra.mxu1 %v3030_v50  ;;  %223 = vmatprep.mubr.f32.mxu0 %v2584_v3 }
  0x38   :  { %336 = vmatprep.mubr.f32.mxu1 %v2584_v3  ;;  %1900 = vmatprep.subr.bf16.mxu0 %v3040_v54 }
  0x39   :  { %224 = vmatmul.mubr.f32.gmra.mrb[10].mxu0 %v40_v58  ;;  %1932 = vmatprep.subr.bf16.mxu1 %v3050_v59 }
  0x3a   :  { %337 = vmatmul.mubr.f32.gmra.mrb[10].mxu1 %v40_v58  ;;  %1902 = vmatpush1.bf16.msra.mxu0 %v3059_v0 }
  0x3b   :  { %1934 = vmatpush1.bf16.msra.mxu1 %v3072_v6  ;;  %229 = vmatprep.mubr.f32.mxu0 %v2584_v3 }
  0x3c   :  { %342 = vmatprep.mubr.f32.mxu1 %v2584_v3  ;;  %1904 = vmatprep.subr.bf16.mxu0 %v3082_v10 }
  0x3d   :  { %230 = vmatmul.mubr.f32.gmra.mrb[12].mxu0 %v41_v15  ;;  %1936 = vmatprep.subr.bf16.mxu1 %v3092_v16 }
  0x3e   :  { %343 = vmatmul.mubr.f32.gmra.mrb[12].mxu1 %v41_v15  ;;  %1906 = vmatpush1.bf16.msra.mxu0 %v3101_v20 }
  0x3f   :  { %1938 = vmatpush1.bf16.msra.mxu1 %v3114_v26  ;;  %235 = vmatprep.mubr.f32.mxu0 %v2584_v3 }
  0x40   :  { %348 = vmatprep.mubr.f32.mxu1 %v2584_v3  ;;  %1908 = vmatprep.subr.bf16.mxu0 %v3124_v30 }
  0x41   :  { %236 = vmatmul.mubr.f32.gmra.mrb[14].mxu0 %v42_v34  ;;  %1940 = vmatprep.subr.bf16.mxu1 %v3134_v36 }
  0x42   :  { %349 = vmatmul.mubr.f32.gmra.mrb[14].mxu1 %v42_v34  ;;  %1910 = vmatpush1.bf16.msra.mxu0 %v3137_v37 }
  0x43   :  { %1942 = vmatpush1.bf16.msra.mxu1 %v3141_v39  ;;  %485 = vmatprep.mubr.f32.mxu0 %v2584_v3 }
  0x44   :  { %556 = vmatprep.mubr.f32.mxu1 %v2584_v3  ;;  %1944 = vmatprep.subr.bf16.mxu0 %v2829_v40 }
  0x45   :  { %486 = vmatmul.mubr.f32.vlgmr.msra.gmra.mrb[0].mxu0 %v2584_v3  ;;  %1976 = vmatprep.subr.bf16.mxu1 %v2837_v43 }
  0x46   :  { %557 = vmatmul.mubr.f32.vlgmr.msra.gmra.mrb[0].mxu1 %v2584_v3  ;;  %1946 = vmatpush1.bf16.msra.mxu0 %v2852_v49 }
  0x47   :  { %1978 = vmatpush1.bf16.msra.mxu1 %v2864_v53  ;;  %1948 = vmatprep.subr.bf16.mxu0 %v2873_v56 }
  0x48   :  { %1980 = vmatprep.subr.bf16.mxu1 %v2882_v60  ;;  %655 = vmatprep.mubr.f32.mxu0 %v2584_v3 }
  0x49   :  { %726 = vmatprep.mubr.f32.mxu1 %v2584_v3 }
  0x4a   :  { %1950 = vmatpush1.bf16.msra.mxu0 %v2891_v63 }
  0x4b   :  { %1982 = vmatpush1.bf16.msra.mxu1 %v2904_v4  ;;  %1952 = vmatprep.subr.bf16.mxu0 %v2914_v7 }
  0x4c   :  { %1984 = vmatprep.subr.bf16.mxu1 %v2924_v11 }
  0x4e   :  { %1954 = vmatpush1.bf16.msra.mxu0 %v2933_v14 }
  0x4f   :  { %1986 = vmatpush1.bf16.msra.mxu1 %v2946_v18  ;;  %1956 = vmatprep.subr.bf16.mxu0 %v2956_v21 }
  0x50   :  { %1988 = vmatprep.subr.bf16.mxu1 %v2966_v25 }
  0x52   :  { %1958 = vmatpush1.bf16.msra.mxu0 %v2975_v28 }
  0x53   :  { %1990 = vmatpush1.bf16.msra.mxu1 %v2988_v32  ;;  %1960 = vmatprep.subr.bf16.mxu0 %v2998_v35 }
  0x54   :  { %1992 = vmatprep.subr.bf16.mxu1 %v3008_v41 }
  0x56   :  { %1962 = vmatpush1.bf16.msra.mxu0 %v3017_v45 }
  0x57   :  { %1994 = vmatpush1.bf16.msra.mxu1 %v3030_v50  ;;  %1964 = vmatprep.subr.bf16.mxu0 %v3040_v54 }
  0x58   :  { %1996 = vmatprep.subr.bf16.mxu1 %v3050_v59 }
  0x5a   :  { %1966 = vmatpush1.bf16.msra.mxu0 %v3059_v0 }
  0x5b   :  { %1998 = vmatpush1.bf16.msra.mxu1 %v3072_v6  ;;  %1968 = vmatprep.subr.bf16.mxu0 %v3082_v10 }
  0x5c   :  { %2000 = vmatprep.subr.bf16.mxu1 %v3092_v16 }
  0x5e   :  { %1970 = vmatpush1.bf16.msra.mxu0 %v3101_v20 }
  0x5f   :  { %2002 = vmatpush1.bf16.msra.mxu1 %v3114_v26  ;;  %1972 = vmatprep.subr.bf16.mxu0 %v3124_v30 }
  0x60   :  { %2004 = vmatprep.subr.bf16.mxu1 %v3134_v36 }
  0x62   :  { %1974 = vmatpush1.bf16.msra.mxu0 %v3137_v37 }
  0x63   :  { %2006 = vmatpush1.bf16.msra.mxu1 %v3141_v39  ;;  %2008 = vmatprep.subr.bf16.mxu0 %v2829_v40 }
  0x64   :  { %2040 = vmatprep.subr.bf16.mxu1 %v2837_v43 }
 0x118   :  { %v487_v52 = vpop.f32.mrb[0].mxu0 }
 0x119   :  { %v2391_v57 = vadd.f32 %v487_v52, %v3191_v48  ;;  %v558_v58 = vpop.f32.mrb[0].mxu1  ;;  %v489_v61 = vpop.f32.mrb[1].mxu0 }
 0x11a   :  { %v2392_v62 = vadd.f32 %v489_v61, %v3193_v51  ;;  %v560_v1 = vpop.f32.mrb[1].mxu1  ;;  %v2407_v17 = vadd.f32 %v558_v58, %v3200_v13 }
 0x11b   :  { %v1791_v2 = vmul.f32 -1.442695, %v2391_v57  ;;  %v2408_v12 = vadd.f32 %v560_v1, %v3197_v8 }
 0x11c   :  { %v1792_v5 = vmul.f32 -1.442695, %v2392_v62 }
 0x11d   :  { %2456 = vpow2.f32 %v1791_v2  ;;  %v1793_v15 = vmul.f32 -1.442695, %v2408_v12 }
 0x11e   :  { %2458 = vpow2.f32 %v1792_v5 }
 0x11f   :  { %2460 = vpow2.f32 %v1793_v15 }
 0x120   :  { %2462 = vtanh.f32 %v2407_v17 }
 0x127   :  { %v2457_v19 = vpop.eup %2456 }
 0x128   :  { %v2459_v22 = vpop.eup %2458  ;;  %v570_v23 = vadd.f32 1.0, %v2457_v19 }
 0x129   :  { %v576_v24 = vadd.f32 1.0, %v2459_v22  ;;  %v2461_v27 = vpop.eup %2460 }
 0x12a   :  { %2464 = vrcp.f32 %v570_v23  ;;  %v2463_v29 = vpop.eup %2462  ;;  %v583_v38 = vadd.f32 1.0, %v2461_v27 }
 0x12b   :  { %2466 = vrcp.f32 %v576_v24 }
 0x12c   :  { %2468 = vrcp.f32 %v583_v38 }
 0x134   :  { %v2465_v31 = vpop.eup %2464 }
 0x135   :  { %v2467_v33 = vpop.eup %2466  ;;  %v587_v34 = vmul.f32 %v2465_v31, %v2463_v29 }
 0x136   :  { %v586_v42 = vmul.f32 0.0, %v2467_v33  ;;  %v2469_v46 = vpop.eup %2468 }
 0x138   :  { %v3203_v44 = vadd.f32 %v587_v34, %v586_v42 }
 0x13a   :  { %2470 = vtanh.f32 %v3203_v44 }
 0x144   :  { %v2471_v47 = vpop.eup %2470 }
 0x145   :  { %v590_v52 = vmul.f32 %v2471_v47, %v2469_v46 }
 0x147   :  { %656 = vmatmul.mubr.f32.vlgmr.msra.gmra.mrb[2].mxu0 %v590_v52  ;;  %727 = vmatmul.mubr.f32.vlgmr.msra.gmra.mrb[2].mxu1 %v590_v52 }
 0x148   :  { %2010 = vmatpush1.bf16.msra.mxu0 %v2852_v49  ;;  %2042 = vmatpush1.bf16.msra.mxu1 %v2864_v53 }
 0x149   :  { %2012 = vmatprep.subr.bf16.mxu0 %v2873_v56  ;;  %2044 = vmatprep.subr.bf16.mxu1 %v2882_v60 }
 0x14a   :  { %825 = vmatprep.mubr.f32.mxu0 %v2584_v3  ;;  %896 = vmatprep.mubr.f32.mxu1 %v2584_v3 }
 0x14c   :  { %2014 = vmatpush1.bf16.msra.mxu0 %v2891_v63  ;;  %2046 = vmatpush1.bf16.msra.mxu1 %v2904_v4 }
 0x14d   :  { %2016 = vmatprep.subr.bf16.mxu0 %v2914_v7  ;;  %2048 = vmatprep.subr.bf16.mxu1 %v2924_v11 }
 0x150   :  { %2018 = vmatpush1.bf16.msra.mxu0 %v2933_v14  ;;  %2050 = vmatpush1.bf16.msra.mxu1 %v2946_v18 }
 0x151   :  { %2020 = vmatprep.subr.bf16.mxu0 %v2956_v21  ;;  %2052 = vmatprep.subr.bf16.mxu1 %v2966_v25 }
 0x154   :  { %2022 = vmatpush1.bf16.msra.mxu0 %v2975_v28  ;;  %2054 = vmatpush1.bf16.msra.mxu1 %v2988_v32 }
 0x155   :  { %2024 = vmatprep.subr.bf16.mxu0 %v2998_v35  ;;  %2056 = vmatprep.subr.bf16.mxu1 %v3008_v41 }
 0x158   :  { %2026 = vmatpush1.bf16.msra.mxu0 %v3017_v45  ;;  %2058 = vmatpush1.bf16.msra.mxu1 %v3030_v50 }
 0x159   :  { %2028 = vmatprep.subr.bf16.mxu0 %v3040_v54  ;;  %2060 = vmatprep.subr.bf16.mxu1 %v3050_v59 }
 0x15c   :  { %2030 = vmatpush1.bf16.msra.mxu0 %v3059_v0  ;;  %2062 = vmatpush1.bf16.msra.mxu1 %v3072_v6 }
 0x15d   :  { %2032 = vmatprep.subr.bf16.mxu0 %v3082_v10  ;;  %2064 = vmatprep.subr.bf16.mxu1 %v3092_v16 }
 0x160   :  { %2034 = vmatpush1.bf16.msra.mxu0 %v3101_v20  ;;  %2066 = vmatpush1.bf16.msra.mxu1 %v3114_v26 }
 0x161   :  { %2036 = vmatprep.subr.bf16.mxu0 %v3124_v30  ;;  %2068 = vmatprep.subr.bf16.mxu1 %v3134_v36 }
 0x164   :  { %2038 = vmatpush1.bf16.msra.mxu0 %v3137_v37  ;;  %2070 = vmatpush1.bf16.msra.mxu1 %v3141_v39 }
 0x165   :  { %2072 = vmatprep.subr.bf16.mxu0 %v2829_v40  ;;  %2104 = vmatprep.subr.bf16.mxu1 %v2837_v43 }
 0x21a   :  { %v657_v55 = vpop.f32.mrb[2].mxu0  ;;  %v728_v57 = vpop.f32.mrb[2].mxu1 }
 0x21b   :  { %v2393_v58 = vadd.f32 %v657_v55, %v3191_v48  ;;  %v659_v61 = vpop.f32.mrb[3].mxu0  ;;  %v730_v62 = vpop.f32.mrb[3].mxu1  ;;  %v2409_v15 = vadd.f32 %v728_v57, %v3200_v13 }
 0x21c   :  { %v2394_v1 = vadd.f32 %v659_v61, %v3193_v51  ;;  %v2410_v9 = vadd.f32 %v730_v62, %v3197_v8 }
 0x21d   :  { %v1794_v2 = vmul.f32 -1.442695, %v2393_v58 }
 0x21e   :  { %v1795_v5 = vmul.f32 -1.442695, %v2394_v1  ;;  %v1796_v12 = vmul.f32 -1.442695, %v2410_v9 }
 0x21f   :  { %2472 = vpow2.f32 %v1794_v2 }
 0x220   :  { %2474 = vpow2.f32 %v1795_v5 }
 0x221   :  { %2476 = vpow2.f32 %v1796_v12 }
 0x222   :  { %2478 = vtanh.f32 %v2409_v15 }
 0x229   :  { %v2473_v17 = vpop.eup %2472 }
 0x22a   :  { %v2475_v19 = vpop.eup %2474  ;;  %v740_v22 = vadd.f32 1.0, %v2473_v17 }
 0x22b   :  { %v746_v23 = vadd.f32 1.0, %v2475_v19  ;;  %v2477_v24 = vpop.eup %2476 }
 0x22c   :  { %2480 = vrcp.f32 %v740_v22  ;;  %v2479_v27 = vpop.eup %2478  ;;  %v753_v34 = vadd.f32 1.0, %v2477_v24 }
 0x22d   :  { %2482 = vrcp.f32 %v746_v23 }
 0x22e   :  { %2484 = vrcp.f32 %v753_v34 }
 0x236   :  { %v2481_v29 = vpop.eup %2480 }
 0x237   :  { %v2483_v31 = vpop.eup %2482  ;;  %v757_v33 = vmul.f32 %v2481_v29, %v2479_v27 }
 0x238   :  { %v756_v38 = vmul.f32 %v2483_v31, %v3203_v44  ;;  %v2485_v46 = vpop.eup %2484 }
 0x23a   :  { %v3245_v42 = vadd.f32 %v757_v33, %v756_v38 }
 0x23c   :  { %2486 = vtanh.f32 %v3245_v42 }
 0x246   :  { %v2487_v47 = vpop.eup %2486 }
 0x247   :  { %v760_v52 = vmul.f32 %v2487_v47, %v2485_v46 }
 0x249   :  { %826 = vmatmul.mubr.f32.vlgmr.msra.gmra.mrb[4].mxu0 %v760_v52  ;;  %897 = vmatmul.mubr.f32.vlgmr.msra.gmra.mrb[4].mxu1 %v760_v52 }
 0x24a   :  { %2074 = vmatpush1.bf16.msra.mxu0 %v2852_v49  ;;  %2106 = vmatpush1.bf16.msra.mxu1 %v2864_v53 }
 0x24b   :  { %2076 = vmatprep.subr.bf16.mxu0 %v2873_v56  ;;  %2108 = vmatprep.subr.bf16.mxu1 %v2882_v60 }
 0x24c   :  { %995 = vmatprep.mubr.f32.mxu0 %v2584_v3  ;;  %1066 = vmatprep.mubr.f32.mxu1 %v2584_v3 }
 0x24e   :  { %2078 = vmatpush1.bf16.msra.mxu0 %v2891_v63  ;;  %2110 = vmatpush1.bf16.msra.mxu1 %v2904_v4 }
 0x24f   :  { %2080 = vmatprep.subr.bf16.mxu0 %v2914_v7  ;;  %2112 = vmatprep.subr.bf16.mxu1 %v2924_v11 }
 0x252   :  { %2082 = vmatpush1.bf16.msra.mxu0 %v2933_v14  ;;  %2114 = vmatpush1.bf16.msra.mxu1 %v2946_v18 }
 0x253   :  { %2084 = vmatprep.subr.bf16.mxu0 %v2956_v21  ;;  %2116 = vmatprep.subr.bf16.mxu1 %v2966_v25 }
 0x256   :  { %2086 = vmatpush1.bf16.msra.mxu0 %v2975_v28  ;;  %2118 = vmatpush1.bf16.msra.mxu1 %v2988_v32 }
 0x257   :  { %2088 = vmatprep.subr.bf16.mxu0 %v2998_v35  ;;  %2120 = vmatprep.subr.bf16.mxu1 %v3008_v41 }
 0x25a   :  { %2090 = vmatpush1.bf16.msra.mxu0 %v3017_v45  ;;  %2122 = vmatpush1.bf16.msra.mxu1 %v3030_v50 }
 0x25b   :  { %2092 = vmatprep.subr.bf16.mxu0 %v3040_v54  ;;  %2124 = vmatprep.subr.bf16.mxu1 %v3050_v59 }
 0x25e   :  { %2094 = vmatpush1.bf16.msra.mxu0 %v3059_v0  ;;  %2126 = vmatpush1.bf16.msra.mxu1 %v3072_v6 }
 0x25f   :  { %2096 = vmatprep.subr.bf16.mxu0 %v3082_v10  ;;  %2128 = vmatprep.subr.bf16.mxu1 %v3092_v16 }
 0x262   :  { %2098 = vmatpush1.bf16.msra.mxu0 %v3101_v20  ;;  %2130 = vmatpush1.bf16.msra.mxu1 %v3114_v26 }
 0x263   :  { %2100 = vmatprep.subr.bf16.mxu0 %v3124_v30  ;;  %2132 = vmatprep.subr.bf16.mxu1 %v3134_v36 }
 0x266   :  { %2102 = vmatpush1.bf16.msra.mxu0 %v3137_v37  ;;  %2134 = vmatpush1.bf16.msra.mxu1 %v3141_v39 }
 0x267   :  { %2136 = vmatprep.subr.bf16.mxu0 %v2829_v40  ;;  %2168 = vmatprep.subr.bf16.mxu1 %v2837_v43 }
 0x31c   :  { %v827_v44 = vpop.f32.mrb[4].mxu0  ;;  %v898_v55 = vpop.f32.mrb[4].mxu1 }
 0x31d   :  { %v2395_v57 = vadd.f32 %v827_v44, %v3191_v48  ;;  %v829_v58 = vpop.f32.mrb[5].mxu0  ;;  %v900_v61 = vpop.f32.mrb[5].mxu1  ;;  %v2411_v12 = vadd.f32 %v898_v55, %v3200_v13 }
 0x31e   :  { %v2396_v62 = vadd.f32 %v829_v58, %v3193_v51  ;;  %v2412_v5 = vadd.f32 %v900_v61, %v3197_v8 }
 0x31f   :  { %v1797_v1 = vmul.f32 -1.442695, %v2395_v57 }
 0x320   :  { %v1798_v2 = vmul.f32 -1.442695, %v2396_v62  ;;  %v1799_v9 = vmul.f32 -1.442695, %v2412_v5 }
 0x321   :  { %2488 = vpow2.f32 %v1797_v1 }
 0x322   :  { %2490 = vpow2.f32 %v1798_v2 }
 0x323   :  { %2492 = vpow2.f32 %v1799_v9 }
 0x324   :  { %2494 = vtanh.f32 %v2411_v12 }
 0x32b   :  { %v2489_v15 = vpop.eup %2488 }
 0x32c   :  { %v2491_v17 = vpop.eup %2490  ;;  %v910_v19 = vadd.f32 1.0, %v2489_v15 }
 0x32d   :  { %v916_v22 = vadd.f32 1.0, %v2491_v17  ;;  %v2493_v23 = vpop.eup %2492 }
 0x32e   :  { %2496 = vrcp.f32 %v910_v19  ;;  %v2495_v24 = vpop.eup %2494  ;;  %v923_v33 = vadd.f32 1.0, %v2493_v23 }
 0x32f   :  { %2498 = vrcp.f32 %v916_v22 }
 0x330   :  { %2500 = vrcp.f32 %v923_v33 }
 0x338   :  { %v2497_v27 = vpop.eup %2496 }
 0x339   :  { %v2499_v29 = vpop.eup %2498  ;;  %v927_v31 = vmul.f32 %v2497_v27, %v2495_v24 }
 0x33a   :  { %v926_v34 = vmul.f32 %v2499_v29, %v3245_v42  ;;  %v2501_v46 = vpop.eup %2500 }
 0x33c   :  { %v3287_v38 = vadd.f32 %v927_v31, %v926_v34 }
 0x33e   :  { %2502 = vtanh.f32 %v3287_v38 }
 0x348   :  { %v2503_v47 = vpop.eup %2502 }
 0x349   :  { %v930_v52 = vmul.f32 %v2503_v47, %v2501_v46 }
 0x34b   :  { %996 = vmatmul.mubr.f32.vlgmr.msra.gmra.mrb[6].mxu0 %v930_v52  ;;  %1067 = vmatmul.mubr.f32.vlgmr.msra.gmra.mrb[6].mxu1 %v930_v52 }
 0x34c   :  { %2138 = vmatpush1.bf16.msra.mxu0 %v2852_v49  ;;  %2170 = vmatpush1.bf16.msra.mxu1 %v2864_v53 }
 0x34d   :  { %2140 = vmatprep.subr.bf16.mxu0 %v2873_v56  ;;  %2172 = vmatprep.subr.bf16.mxu1 %v2882_v60 }
 0x34e   :  { %1165 = vmatprep.mubr.f32.mxu0 %v2584_v3  ;;  %1236 = vmatprep.mubr.f32.mxu1 %v2584_v3 }
 0x350   :  { %2142 = vmatpush1.bf16.msra.mxu0 %v2891_v63  ;;  %2174 = vmatpush1.bf16.msra.mxu1 %v2904_v4 }
 0x351   :  { %2144 = vmatprep.subr.bf16.mxu0 %v2914_v7  ;;  %2176 = vmatprep.subr.bf16.mxu1 %v2924_v11 }
 0x354   :  { %2146 = vmatpush1.bf16.msra.mxu0 %v2933_v14  ;;  %2178 = vmatpush1.bf16.msra.mxu1 %v2946_v18 }
 0x355   :  { %2148 = vmatprep.subr.bf16.mxu0 %v2956_v21  ;;  %2180 = vmatprep.subr.bf16.mxu1 %v2966_v25 }
 0x358   :  { %2150 = vmatpush1.bf16.msra.mxu0 %v2975_v28  ;;  %2182 = vmatpush1.bf16.msra.mxu1 %v2988_v32 }
 0x359   :  { %2152 = vmatprep.subr.bf16.mxu0 %v2998_v35  ;;  %2184 = vmatprep.subr.bf16.mxu1 %v3008_v41 }
 0x35c   :  { %2154 = vmatpush1.bf16.msra.mxu0 %v3017_v45  ;;  %2186 = vmatpush1.bf16.msra.mxu1 %v3030_v50 }
 0x35d   :  { %2156 = vmatprep.subr.bf16.mxu0 %v3040_v54  ;;  %2188 = vmatprep.subr.bf16.mxu1 %v3050_v59 }
 0x360   :  { %2158 = vmatpush1.bf16.msra.mxu0 %v3059_v0  ;;  %2190 = vmatpush1.bf16.msra.mxu1 %v3072_v6 }
 0x361   :  { %2160 = vmatprep.subr.bf16.mxu0 %v3082_v10  ;;  %2192 = vmatprep.subr.bf16.mxu1 %v3092_v16 }
 0x364   :  { %2162 = vmatpush1.bf16.msra.mxu0 %v3101_v20  ;;  %2194 = vmatpush1.bf16.msra.mxu1 %v3114_v26 }
 0x365   :  { %2164 = vmatprep.subr.bf16.mxu0 %v3124_v30  ;;  %2196 = vmatprep.subr.bf16.mxu1 %v3134_v36 }
 0x368   :  { %2166 = vmatpush1.bf16.msra.mxu0 %v3137_v37  ;;  %2198 = vmatpush1.bf16.msra.mxu1 %v3141_v39 }
 0x369   :  { %2200 = vmatprep.subr.bf16.mxu0 %v2829_v40  ;;  %2232 = vmatprep.subr.bf16.mxu1 %v2837_v43 }
 0x41e   :  { %v997_v42 = vpop.f32.mrb[6].mxu0  ;;  %v1068_v44 = vpop.f32.mrb[6].mxu1 }
 0x41f   :  { %v2397_v55 = vadd.f32 %v997_v42, %v3191_v48  ;;  %v999_v57 = vpop.f32.mrb[7].mxu0  ;;  %v1070_v58 = vpop.f32.mrb[7].mxu1  ;;  %v2413_v9 = vadd.f32 %v1068_v44, %v3200_v13 }
 0x420   :  { %v2398_v61 = vadd.f32 %v999_v57, %v3193_v51  ;;  %v2414_v2 = vadd.f32 %v1070_v58, %v3197_v8 }
 0x421   :  { %v1800_v62 = vmul.f32 -1.442695, %v2397_v55 }
 0x422   :  { %v1801_v1 = vmul.f32 -1.442695, %v2398_v61  ;;  %v1802_v5 = vmul.f32 -1.442695, %v2414_v2 }
 0x423   :  { %2504 = vpow2.f32 %v1800_v62 }
 0x424   :  { %2506 = vpow2.f32 %v1801_v1 }
 0x425   :  { %2508 = vpow2.f32 %v1802_v5 }
 0x426   :  { %2510 = vtanh.f32 %v2413_v9 }
 0x42d   :  { %v2505_v12 = vpop.eup %2504 }
 0x42e   :  { %v2507_v15 = vpop.eup %2506  ;;  %v1080_v17 = vadd.f32 1.0, %v2505_v12 }
 0x42f   :  { %v1086_v19 = vadd.f32 1.0, %v2507_v15  ;;  %v2509_v22 = vpop.eup %2508 }
 0x430   :  { %2512 = vrcp.f32 %v1080_v17  ;;  %v2511_v23 = vpop.eup %2510  ;;  %v1093_v31 = vadd.f32 1.0, %v2509_v22 }
 0x431   :  { %2514 = vrcp.f32 %v1086_v19 }
 0x432   :  { %2516 = vrcp.f32 %v1093_v31 }
 0x43a   :  { %v2513_v24 = vpop.eup %2512 }
 0x43b   :  { %v2515_v27 = vpop.eup %2514  ;;  %v1097_v29 = vmul.f32 %v2513_v24, %v2511_v23 }
 0x43c   :  { %v1096_v33 = vmul.f32 %v2515_v27, %v3287_v38  ;;  %v2517_v46 = vpop.eup %2516 }
 0x43e   :  { %v3329_v34 = vadd.f32 %v1097_v29, %v1096_v33 }
 0x440   :  { %2518 = vtanh.f32 %v3329_v34 }
 0x44a   :  { %v2519_v47 = vpop.eup %2518 }
 0x44b   :  { %v1100_v52 = vmul.f32 %v2519_v47, %v2517_v46 }
 0x44d   :  { %1166 = vmatmul.mubr.f32.vlgmr.msra.gmra.mrb[8].mxu0 %v1100_v52  ;;  %1237 = vmatmul.mubr.f32.vlgmr.msra.gmra.mrb[8].mxu1 %v1100_v52 }
 0x44e   :  { %2202 = vmatpush1.bf16.msra.mxu0 %v2852_v49  ;;  %2234 = vmatpush1.bf16.msra.mxu1 %v2864_v53 }
 0x44f   :  { %2204 = vmatprep.subr.bf16.mxu0 %v2873_v56  ;;  %2236 = vmatprep.subr.bf16.mxu1 %v2882_v60 }
 0x450   :  { %1335 = vmatprep.mubr.f32.mxu0 %v2584_v3  ;;  %1406 = vmatprep.mubr.f32.mxu1 %v2584_v3 }
 0x452   :  { %2206 = vmatpush1.bf16.msra.mxu0 %v2891_v63  ;;  %2238 = vmatpush1.bf16.msra.mxu1 %v2904_v4 }
 0x453   :  { %2208 = vmatprep.subr.bf16.mxu0 %v2914_v7  ;;  %2240 = vmatprep.subr.bf16.mxu1 %v2924_v11 }
 0x456   :  { %2210 = vmatpush1.bf16.msra.mxu0 %v2933_v14  ;;  %2242 = vmatpush1.bf16.msra.mxu1 %v2946_v18 }
 0x457   :  { %2212 = vmatprep.subr.bf16.mxu0 %v2956_v21  ;;  %2244 = vmatprep.subr.bf16.mxu1 %v2966_v25 }
 0x45a   :  { %2214 = vmatpush1.bf16.msra.mxu0 %v2975_v28  ;;  %2246 = vmatpush1.bf16.msra.mxu1 %v2988_v32 }
 0x45b   :  { %2216 = vmatprep.subr.bf16.mxu0 %v2998_v35  ;;  %2248 = vmatprep.subr.bf16.mxu1 %v3008_v41 }
 0x45e   :  { %2218 = vmatpush1.bf16.msra.mxu0 %v3017_v45  ;;  %2250 = vmatpush1.bf16.msra.mxu1 %v3030_v50 }
 0x45f   :  { %2220 = vmatprep.subr.bf16.mxu0 %v3040_v54  ;;  %2252 = vmatprep.subr.bf16.mxu1 %v3050_v59 }
 0x462   :  { %2222 = vmatpush1.bf16.msra.mxu0 %v3059_v0  ;;  %2254 = vmatpush1.bf16.msra.mxu1 %v3072_v6 }
 0x463   :  { %2224 = vmatprep.subr.bf16.mxu0 %v3082_v10  ;;  %2256 = vmatprep.subr.bf16.mxu1 %v3092_v16 }
 0x466   :  { %2226 = vmatpush1.bf16.msra.mxu0 %v3101_v20  ;;  %2258 = vmatpush1.bf16.msra.mxu1 %v3114_v26 }
 0x467   :  { %2228 = vmatprep.subr.bf16.mxu0 %v3124_v30  ;;  %2260 = vmatprep.subr.bf16.mxu1 %v3134_v36 }
 0x46a   :  { %2230 = vmatpush1.bf16.msra.mxu0 %v3137_v37  ;;  %2262 = vmatpush1.bf16.msra.mxu1 %v3141_v39 }
 0x46b   :  { %2264 = vmatprep.subr.bf16.mxu0 %v2829_v40  ;;  %2296 = vmatprep.subr.bf16.mxu1 %v2837_v43 }
 0x520   :  { %v1167_v38 = vpop.f32.mrb[8].mxu0  ;;  %v1238_v42 = vpop.f32.mrb[8].mxu1 }
 0x521   :  { %v2399_v44 = vadd.f32 %v1167_v38, %v3191_v48  ;;  %v1169_v55 = vpop.f32.mrb[9].mxu0  ;;  %v1240_v57 = vpop.f32.mrb[9].mxu1  ;;  %v2415_v5 = vadd.f32 %v1238_v42, %v3200_v13 }
 0x522   :  { %v2400_v58 = vadd.f32 %v1169_v55, %v3193_v51  ;;  %v2416_v1 = vadd.f32 %v1240_v57, %v3197_v8 }
 0x523   :  { %v1803_v61 = vmul.f32 -1.442695, %v2399_v44 }
 0x524   :  { %v1804_v62 = vmul.f32 -1.442695, %v2400_v58  ;;  %v1805_v2 = vmul.f32 -1.442695, %v2416_v1 }
 0x525   :  { %2520 = vpow2.f32 %v1803_v61 }
 0x526   :  { %2522 = vpow2.f32 %v1804_v62 }
 0x527   :  { %2524 = vpow2.f32 %v1805_v2 }
 0x528   :  { %2526 = vtanh.f32 %v2415_v5 }
 0x52f   :  { %v2521_v9 = vpop.eup %2520 }
 0x530   :  { %v2523_v12 = vpop.eup %2522  ;;  %v1250_v15 = vadd.f32 1.0, %v2521_v9 }
 0x531   :  { %v1256_v17 = vadd.f32 1.0, %v2523_v12  ;;  %v2525_v19 = vpop.eup %2524 }
 0x532   :  { %2528 = vrcp.f32 %v1250_v15  ;;  %v2527_v22 = vpop.eup %2526  ;;  %v1263_v29 = vadd.f32 1.0, %v2525_v19 }
 0x533   :  { %2530 = vrcp.f32 %v1256_v17 }
 0x534   :  { %2532 = vrcp.f32 %v1263_v29 }
 0x53c   :  { %v2529_v23 = vpop.eup %2528 }
 0x53d   :  { %v2531_v24 = vpop.eup %2530  ;;  %v1267_v27 = vmul.f32 %v2529_v23, %v2527_v22 }
 0x53e   :  { %v1266_v31 = vmul.f32 %v2531_v24, %v3329_v34  ;;  %v2533_v46 = vpop.eup %2532 }
 0x540   :  { %v3371_v33 = vadd.f32 %v1267_v27, %v1266_v31 }
 0x542   :  { %2534 = vtanh.f32 %v3371_v33 }
 0x54c   :  { %v2535_v47 = vpop.eup %2534 }
 0x54d   :  { %v1270_v52 = vmul.f32 %v2535_v47, %v2533_v46 }
 0x54f   :  { %1336 = vmatmul.mubr.f32.vlgmr.msra.gmra.mrb[10].mxu0 %v1270_v52  ;;  %1407 = vmatmul.mubr.f32.vlgmr.msra.gmra.mrb[10].mxu1 %v1270_v52 }
 0x550   :  { %2266 = vmatpush1.bf16.msra.mxu0 %v2852_v49  ;;  %2298 = vmatpush1.bf16.msra.mxu1 %v2864_v53 }
 0x551   :  { %2268 = vmatprep.subr.bf16.mxu0 %v2873_v56  ;;  %2300 = vmatprep.subr.bf16.mxu1 %v2882_v60 }
 0x552   :  { %1505 = vmatprep.mubr.f32.mxu0 %v2584_v3  ;;  %1576 = vmatprep.mubr.f32.mxu1 %v2584_v3 }
 0x554   :  { %2270 = vmatpush1.bf16.msra.mxu0 %v2891_v63  ;;  %2302 = vmatpush1.bf16.msra.mxu1 %v2904_v4 }
 0x555   :  { %2272 = vmatprep.subr.bf16.mxu0 %v2914_v7  ;;  %2304 = vmatprep.subr.bf16.mxu1 %v2924_v11 }
 0x558   :  { %2274 = vmatpush1.bf16.msra.mxu0 %v2933_v14  ;;  %2306 = vmatpush1.bf16.msra.mxu1 %v2946_v18 }
 0x559   :  { %2276 = vmatprep.subr.bf16.mxu0 %v2956_v21  ;;  %2308 = vmatprep.subr.bf16.mxu1 %v2966_v25 }
 0x55c   :  { %2278 = vmatpush1.bf16.msra.mxu0 %v2975_v28  ;;  %2310 = vmatpush1.bf16.msra.mxu1 %v2988_v32 }
 0x55d   :  { %2280 = vmatprep.subr.bf16.mxu0 %v2998_v35  ;;  %2312 = vmatprep.subr.bf16.mxu1 %v3008_v41 }
 0x560   :  { %2282 = vmatpush1.bf16.msra.mxu0 %v3017_v45  ;;  %2314 = vmatpush1.bf16.msra.mxu1 %v3030_v50 }
 0x561   :  { %2284 = vmatprep.subr.bf16.mxu0 %v3040_v54  ;;  %2316 = vmatprep.subr.bf16.mxu1 %v3050_v59 }
 0x564   :  { %2286 = vmatpush1.bf16.msra.mxu0 %v3059_v0  ;;  %2318 = vmatpush1.bf16.msra.mxu1 %v3072_v6 }
 0x565   :  { %2288 = vmatprep.subr.bf16.mxu0 %v3082_v10  ;;  %2320 = vmatprep.subr.bf16.mxu1 %v3092_v16 }
 0x568   :  { %2290 = vmatpush1.bf16.msra.mxu0 %v3101_v20  ;;  %2322 = vmatpush1.bf16.msra.mxu1 %v3114_v26 }
 0x569   :  { %2292 = vmatprep.subr.bf16.mxu0 %v3124_v30  ;;  %2324 = vmatprep.subr.bf16.mxu1 %v3134_v36 }
 0x56c   :  { %2294 = vmatpush1.bf16.msra.mxu0 %v3137_v37  ;;  %2326 = vmatpush1.bf16.msra.mxu1 %v3141_v39 }
 0x56d   :  { %2328 = vmatprep.subr.bf16.mxu0 %v2829_v40  ;;  %2360 = vmatprep.subr.bf16.mxu1 %v2837_v43 }
 0x622   :  { %v1337_v34 = vpop.f32.mrb[10].mxu0  ;;  %v1408_v38 = vpop.f32.mrb[10].mxu1 }
 0x623   :  { %v2401_v42 = vadd.f32 %v1337_v34, %v3191_v48  ;;  %v1339_v44 = vpop.f32.mrb[11].mxu0  ;;  %v1410_v55 = vpop.f32.mrb[11].mxu1  ;;  %v2417_v2 = vadd.f32 %v1408_v38, %v3200_v13 }
 0x624   :  { %v2402_v57 = vadd.f32 %v1339_v44, %v3193_v51  ;;  %v2418_v62 = vadd.f32 %v1410_v55, %v3197_v8 }
 0x625   :  { %v1806_v58 = vmul.f32 -1.442695, %v2401_v42 }
 0x626   :  { %v1807_v61 = vmul.f32 -1.442695, %v2402_v57  ;;  %v1808_v1 = vmul.f32 -1.442695, %v2418_v62 }
 0x627   :  { %2536 = vpow2.f32 %v1806_v58 }
 0x628   :  { %2538 = vpow2.f32 %v1807_v61 }
 0x629   :  { %2540 = vpow2.f32 %v1808_v1 }
 0x62a   :  { %2542 = vtanh.f32 %v2417_v2 }
 0x631   :  { %v2537_v40 = vpop.eup %2536 }
 0x632   :  { %v2539_v5 = vpop.eup %2538  ;;  %v1420_v43 = vadd.f32 1.0, %v2537_v40 }
 0x633   :  { %v1426_v9 = vadd.f32 1.0, %v2539_v5  ;;  %v2541_v12 = vpop.eup %2540 }
 0x634   :  { %2544 = vrcp.f32 %v1420_v43  ;;  %v2543_v15 = vpop.eup %2542  ;;  %v1433_v23 = vadd.f32 1.0, %v2541_v12 }
 0x635   :  { %2546 = vrcp.f32 %v1426_v9 }
 0x636   :  { %2548 = vrcp.f32 %v1433_v23 }
 0x63e   :  { %v2545_v17 = vpop.eup %2544 }
 0x63f   :  { %v2547_v19 = vpop.eup %2546  ;;  %v1437_v22 = vmul.f32 %v2545_v17, %v2543_v15 }
 0x640   :  { %v1436_v24 = vmul.f32 %v2547_v19, %v3371_v33  ;;  %v2549_v29 = vpop.eup %2548 }
 0x642   :  { %v3413_v27 = vadd.f32 %v1437_v22, %v1436_v24 }
 0x644   :  { %2550 = vtanh.f32 %v3413_v27 }
 0x64e   :  { %v2551_v31 = vpop.eup %2550 }
 0x64f   :  { %v1440_v46 = vmul.f32 %v2551_v31, %v2549_v29 }
 0x651   :  { %1506 = vmatmul.mubr.f32.vlgmr.msra.gmra.mrb[12].mxu0 %v1440_v46  ;;  %1577 = vmatmul.mubr.f32.vlgmr.msra.gmra.mrb[12].mxu1 %v1440_v46 }
 0x652   :  { %2330 = vmatpush1.bf16.msra.mxu0 %v2852_v49  ;;  %2362 = vmatpush1.bf16.msra.mxu1 %v2864_v53 }
 0x653   :  { %2332 = vmatprep.subr.bf16.mxu0 %v2873_v56  ;;  %2364 = vmatprep.subr.bf16.mxu1 %v2882_v60 }
 0x654   :  { %1675 = vmatprep.mubr.f32.mxu0 %v2584_v3  ;;  %1746 = vmatprep.mubr.f32.mxu1 %v2584_v3 }
 0x656   :  { %2334 = vmatpush1.bf16.msra.mxu0 %v2891_v63  ;;  %2366 = vmatpush1.bf16.msra.mxu1 %v2904_v4 }
 0x657   :  { %2336 = vmatprep.subr.bf16.mxu0 %v2914_v7  ;;  %2368 = vmatprep.subr.bf16.mxu1 %v2924_v11 }
 0x65a   :  { %2338 = vmatpush1.bf16.msra.mxu0 %v2933_v14  ;;  %2370 = vmatpush1.bf16.msra.mxu1 %v2946_v18 }
 0x65b   :  { %2340 = vmatprep.subr.bf16.mxu0 %v2956_v21  ;;  %2372 = vmatprep.subr.bf16.mxu1 %v2966_v25 }
 0x65e   :  { %2342 = vmatpush1.bf16.msra.mxu0 %v2975_v28  ;;  %2374 = vmatpush1.bf16.msra.mxu1 %v2988_v32 }
 0x65f   :  { %2344 = vmatprep.subr.bf16.mxu0 %v2998_v35  ;;  %2376 = vmatprep.subr.bf16.mxu1 %v3008_v41 }
 0x662   :  { %2346 = vmatpush1.bf16.msra.mxu0 %v3017_v45  ;;  %2378 = vmatpush1.bf16.msra.mxu1 %v3030_v50 }
 0x663   :  { %2348 = vmatprep.subr.bf16.mxu0 %v3040_v54  ;;  %2380 = vmatprep.subr.bf16.mxu1 %v3050_v59 }
 0x666   :  { %2350 = vmatpush1.bf16.msra.mxu0 %v3059_v0  ;;  %2382 = vmatpush1.bf16.msra.mxu1 %v3072_v6 }
 0x667   :  { %2352 = vmatprep.subr.bf16.mxu0 %v3082_v10  ;;  %2384 = vmatprep.subr.bf16.mxu1 %v3092_v16 }
 0x66a   :  { %2354 = vmatpush1.bf16.msra.mxu0 %v3101_v20  ;;  %2386 = vmatpush1.bf16.msra.mxu1 %v3114_v26 }
 0x66b   :  { %2356 = vmatprep.subr.bf16.mxu0 %v3124_v30  ;;  %2388 = vmatprep.subr.bf16.mxu1 %v3134_v36 }
 0x66e   :  { %2358 = vmatpush1.bf16.msra.mxu0 %v3137_v37  ;;  %2390 = vmatpush1.bf16.msra.mxu1 %v3141_v39 }
 0x724   :  { %v1507_v3 = vpop.f32.mrb[12].mxu0  ;;  %v1578_v49 = vpop.f32.mrb[12].mxu1 }
 0x725   :  { %v2403_v53 = vadd.f32 %v1507_v3, %v3191_v48  ;;  %v1509_v56 = vpop.f32.mrb[13].mxu0  ;;  %v1580_v60 = vpop.f32.mrb[13].mxu1  ;;  %v2419_v18 = vadd.f32 %v1578_v49, %v3200_v13 }
 0x726   :  { %v2404_v63 = vadd.f32 %v1509_v56, %v3193_v51  ;;  %v2420_v11 = vadd.f32 %v1580_v60, %v3197_v8 }
 0x727   :  { %v1809_v4 = vmul.f32 -1.442695, %v2403_v53 }
 0x728   :  { %v1810_v7 = vmul.f32 -1.442695, %v2404_v63  ;;  %v1811_v14 = vmul.f32 -1.442695, %v2420_v11 }
 0x729   :  { %2552 = vpow2.f32 %v1809_v4 }
 0x72a   :  { %2554 = vpow2.f32 %v1810_v7 }
 0x72b   :  { %2556 = vpow2.f32 %v1811_v14 }
 0x72c   :  { %2558 = vtanh.f32 %v2419_v18 }
 0x733   :  { %v2553_v21 = vpop.eup %2552 }
 0x734   :  { %v2555_v25 = vpop.eup %2554  ;;  %v1590_v28 = vadd.f32 1.0, %v2553_v21 }
 0x735   :  { %v1596_v32 = vadd.f32 1.0, %v2555_v25  ;;  %v2557_v35 = vpop.eup %2556 }
 0x736   :  { %2560 = vrcp.f32 %v1590_v28  ;;  %v2559_v41 = vpop.eup %2558  ;;  %v1603_v59 = vadd.f32 1.0, %v2557_v35 }
 0x737   :  { %2562 = vrcp.f32 %v1596_v32 }
 0x738   :  { %2564 = vrcp.f32 %v1603_v59 }
 0x740   :  { %v2561_v45 = vpop.eup %2560 }
 0x741   :  { %v2563_v50 = vpop.eup %2562  ;;  %v1607_v54 = vmul.f32 %v2561_v45, %v2559_v41 }
 0x742   :  { %v1606_v0 = vmul.f32 %v2563_v50, %v3413_v27  ;;  %v2565_v10 = vpop.eup %2564 }
 0x744   :  { %v1608_v6 = vadd.f32 %v1607_v54, %v1606_v0 }
 0x746   :  { %2566 = vtanh.f32 %v1608_v6 }
 0x750   :  { %v2567_v16 = vpop.eup %2566 }
 0x751   :  { %v1610_v20 = vmul.f32 %v2567_v16, %v2565_v10 }
 0x753   :  { %1676 = vmatmul.mubr.f32.vlgmr.msra.gmra.mrb[14].mxu0 %v1610_v20  ;;  %1747 = vmatmul.mubr.f32.vlgmr.msra.gmra.mrb[14].mxu1 %v1610_v20 }
 0x826   :  { %v1677_v26 = vpop.f32.mrb[14].mxu0  ;;  %v1748_v30 = vpop.f32.mrb[14].mxu1 }
 0x827   :  { %v2405_v36 = vadd.f32 %v1677_v26, %v3191_v48  ;;  %v1679_v37 = vpop.f32.mrb[15].mxu0  ;;  %v1750_v39 = vpop.f32.mrb[15].mxu1  ;;  %v2421_v42 = vadd.f32 %v1748_v30, %v3200_v13 }
 0x828   :  { %v2406_v33 = vadd.f32 %v1679_v37, %v3193_v51  ;;  %v2422_v34 = vadd.f32 %v1750_v39, %v3197_v8 }
 0x829   :  { %v1812_v47 = vmul.f32 -1.442695, %v2405_v36 }
 0x82a   :  { %v1813_v52 = vmul.f32 -1.442695, %v2406_v33  ;;  %v1814_v38 = vmul.f32 -1.442695, %v2422_v34 }
 0x82b   :  { %2568 = vpow2.f32 %v1812_v47 }
 0x82c   :  { %2570 = vpow2.f32 %v1813_v52 }
 0x82d   :  { %2572 = vpow2.f32 %v1814_v38 }
 0x82e   :  { %2574 = vtanh.f32 %v2421_v42 }
 0x835   :  { %v2569_v44 = vpop.eup %2568 }
 0x836   :  { %v2571_v55 = vpop.eup %2570  ;;  %v1760_v57 = vadd.f32 1.0, %v2569_v44 }
 0x837   :  { %v1766_v58 = vadd.f32 1.0, %v2571_v55  ;;  %v2573_v48 = vpop.eup %2572 }
 0x838   :  { %2576 = vrcp.f32 %v1760_v57  ;;  %v2575_v61 = vpop.eup %2574  ;;  %v1773_v2 = vadd.f32 1.0, %v2573_v48 }
 0x839   :  { %2578 = vrcp.f32 %v1766_v58 }
 0x83a   :  { %2580 = vrcp.f32 %v1773_v2 }
 0x842   :  { %v2577_v51 = vpop.eup %2576 }
 0x843   :  { %v2579_v62 = vpop.eup %2578  ;;  %v1777_v1 = vmul.f32 %v2577_v51, %v2575_v61 }
 0x844   :  { %v1776_v40 = vmul.f32 %v2579_v62, %v1608_v6  ;;  %v2581_v8 = vpop.eup %2580 }
 0x846   :  { %v1778_v5 = vadd.f32 %v1777_v1, %v1776_v40 }
 0x848   :  { %2582 = vtanh.f32 %v1778_v5 }
 0x852   :  { %v2583_v13 = vpop.eup %2582 }
 0x853   :  { %v1780_v43 = vmul.f32 %v2583_v13, %v2581_v8 }
 0x855   :  { %1786 = vst [vmem:[%s3465_s5] sm:$0xff] %v1780_v43 }

</bundles_post_ra>
